<compile_context>
chip_gen: v7x
topology: tpu7x:2x2x1
jax: 0.10.0
libtpu: 0.0.40
codegen_flags: <defaults>
</compile_context>

<pallas_src>
import functools

import jax
import jax.numpy as jnp
from jax import lax
from jax.experimental import pallas as pl
from jax.experimental.pallas import tpu as pltpu

K = 16  # number of kNN neighbors (fixed inside the PyTorch module)
_VMEM_LIMIT = 32 * 1024 * 1024


def _bf16(x):
    return x.astype(jnp.bfloat16)


def _const_spec(shape):
    """BlockSpec for a weight/bias that is resident for every grid step."""
    return pl.BlockSpec(shape, lambda *_: (0,) * len(shape))


def _tile(n, target, mult=8):
    """Largest row tile <= target that divides n and is a multiple of `mult`
    (falls back to the full dimension, which is always a legal block)."""
    if n <= target:
        return n
    for t in range(target, 0, -mult):
        if t % mult == 0 and n % t == 0:
            return t
    return n


# --------------------------------------------------------------------------
# kNN: exact-f32 VPU scores (2*q.p - ||p||^2) + in-kernel iterative top-K
# selection.  Only the (B, N, K) index tensor is written to HBM; indices are
# buffered and written once per query tile.
# --------------------------------------------------------------------------
def _knn_kernel(q_ref, p_ref, nxx_ref, idx_ref, *, k):
    q = q_ref[0]                                                     # (TQ, 3) f32
    pt = p_ref[0]                                                    # (3, N)  f32
    n = pt.shape[1]

    # Exact f32 inner product via 3 VPU FMAs (lane broadcast of q columns x
    # sublane broadcast of point rows) -- avoids bf16-mantissa MXU passes.
    g = (q[:, 0:1] * pt[0:1, :]
         + q[:, 1:2] * pt[1:2, :]
         + q[:, 2:3] * pt[2:3, :])                                   # (TQ, N)

    # -||q - p||^2 ranking: the per-row constant -||q||^2 is dropped -- it cannot
    # change the per-row top-k order.  (These scores are NOT true distances.)
    scores = 2.0 * g + nxx_ref[0]                                    # (TQ, N)

    colf = lax.broadcasted_iota(jnp.int32, scores.shape, 1).astype(jnp.float32)
    cols = []
    for _ in range(k):
        m = jnp.max(scores, axis=1, keepdims=True)                   # (TQ, 1)
        # first (smallest-index) column attaining the row max
        sel = jnp.min(jnp.where(scores >= m, colf, float(n)),
                      axis=1, keepdims=True)                         # (TQ, 1) f32
        cols.append(sel)
        scores = jnp.where(colf == sel, -jnp.inf, scores)
    # single (TQ, K) store per tile instead of K masked width-1 stores
    idx_ref[0] = jnp.concatenate(cols, axis=1).astype(jnp.int32)


def knn_idx(pts, k=K):
    B, N, D = pts.shape
    assert N < (1 << 24), "float-encoded column indices require N < 2^24"
    pts = pts.astype(jnp.float32)
    pts_t = jnp.transpose(pts, (0, 2, 1))                            # (B, 3, N)
    neg_xx = (-jnp.sum(pts * pts, axis=-1))[:, None, :]              # (B, 1, N)
    tq = _tile(N, 64)
    return pl.pallas_call(
        functools.partial(_knn_kernel, k=k),
        out_shape=jax.ShapeDtypeStruct((B, N, k), jnp.int32),
        grid=(B, N // tq),
        in_specs=[pl.BlockSpec((1, tq, D), lambda b, i: (b, i, 0)),   # query tile
                  pl.BlockSpec((1, D, N), lambda b, i: (b, 0, 0)),    # all points^T
                  pl.BlockSpec((1, 1, N), lambda b, i: (b, 0, 0))],   # -||p||^2
        out_specs=pl.BlockSpec((1, tq, k), lambda b, i: (b, i, 0)),
        compiler_params=pltpu.CompilerParams(
            dimension_semantics=("parallel", "parallel"),
            vmem_limit_bytes=_VMEM_LIMIT),
    )(pts, pts_t, neg_xx)


# --------------------------------------------------------------------------
# Neighbor gather helpers (kept in XLA; gather fuses with the reduction).
# --------------------------------------------------------------------------
def neighbor_maxpool(x, idx):
    """local_maxpool: out[b, i] = max_k x[b, idx[b, i, k]]  -- (B, N, C)."""
    # TODO(synk): no clean general Pallas TPU lowering for data-dependent row
    # gather; XLA fuses the gather into the max, so (B, N, K, C) never hits HBM.
    return jax.vmap(lambda xb, ib: jnp.max(xb[ib], axis=1))(x, idx)


def _local_cov_features(pts, idx):
    """torch local_cov in (B, N, C) layout -> (B, N, 12)."""
    B, N, _ = pts.shape
    nbr = jax.vmap(lambda pb, ib: pb[ib[:, :2]])(pts, idx)           # (B, N, 2, 3)
    x0, x1 = nbr[:, :, 0, :], nbr[:, :, 1, :]                        # self + 1st neighbor
    cov9 = (x0[..., :, None] * x1[..., None, :]).reshape(B, N, 9)    # row-major 3x3 outer
    return jnp.concatenate([pts, cov9], axis=-1)                     # (B, N, 12)


# --------------------------------------------------------------------------
# mlp1: Conv1d(12,64,1)+ReLU, Conv1d(64,64,1)+ReLU, Conv1d(64,64,1)+ReLU
# Rows flattened to (B*N, C), big row tiles, bf16 MXU inputs / f32 accumulation.
# --------------------------------------------------------------------------
def _mlp1_kernel(x_ref, w1, b1, w2, b2, w3, b3, o_ref):
    x = x_ref[...]                                                   # (TN, 12) bf16
    h = jnp.maximum(jnp.dot(x, w1[...], preferred_element_type=jnp.float32) + b1[...], 0.0)
    h = jnp.maximum(jnp.dot(_bf16(h), w2[...], preferred_element_type=jnp.float32) + b2[...], 0.0)
    h = jnp.maximum(jnp.dot(_bf16(h), w3[...], preferred_element_type=jnp.float32) + b3[...], 0.0)
    o_ref[...] = _bf16(h)


def mlp1(x, p):
    B, N, Cin = x.shape
    R = B * N
    xf = x.reshape(R, Cin)
    tn = _tile(R, 2048)
    out = pl.pallas_call(
        _mlp1_kernel,
        out_shape=jax.ShapeDtypeStruct((R, 64), jnp.bfloat16),
        grid=(R // tn,),
        in_specs=[pl.BlockSpec((tn, Cin), lambda i: (i, 0)),
                  _const_spec(p["mlp1_w1"].shape), _const_spec(p["mlp1_b1"].shape),
                  _const_spec(p["mlp1_w2"].shape), _const_spec(p["mlp1_b2"].shape),
                  _const_spec(p["mlp1_w3"].shape), _const_spec(p["mlp1_b3"].shape)],
        out_specs=pl.BlockSpec((tn, 64), lambda i: (i, 0)),
        compiler_params=pltpu.CompilerParams(
            dimension_semantics=("parallel",),
            vmem_limit_bytes=_VMEM_LIMIT),
    )(xf, p["mlp1_w1"], p["mlp1_b1"], p["mlp1_w2"], p["mlp1_b2"],
      p["mlp1_w3"], p["mlp1_b3"])
    return out.reshape(B, N, 64)


# --------------------------------------------------------------------------
# graph stage 1 (fused): Linear(64,64) -> Conv1d(64,128,1) -> ReLU
# collapsed to one 64x128 matmul (no nonlinearity between linear1 and conv1).
# --------------------------------------------------------------------------
def _stage1_kernel(x_ref, w, b, o_ref):
    x = x_ref[...]                                                   # (TN, 64) bf16
    y = jnp.dot(x, w[...], preferred_element_type=jnp.float32) + b[...]
    o_ref[...] = _bf16(jnp.maximum(y, 0.0))


def graph_stage1(x, p):
    B, N, Cin = x.shape
    Cout = p["stage1_w"].shape[1]
    R = B * N
    xf = x.reshape(R, Cin)
    tn = _tile(R, 2048)
    out = pl.pallas_call(
        _stage1_kernel,
        out_shape=jax.ShapeDtypeStruct((R, Cout), jnp.bfloat16),
        grid=(R // tn,),
        in_specs=[pl.BlockSpec((tn, Cin), lambda i: (i, 0)),
                  _const_spec(p["stage1_w"].shape), _const_spec(p["stage1_b"].shape)],
        out_specs=pl.BlockSpec((tn, Cout), lambda i: (i, 0)),
        compiler_params=pltpu.CompilerParams(
            dimension_semantics=("parallel",),
            vmem_limit_bytes=_VMEM_LIMIT),
    )(xf, p["stage1_w"], p["stage1_b"])
    return out.reshape(B, N, Cout)


# --------------------------------------------------------------------------
# Fused stage 2 + global max-pool:
#   [Linear(128,128) -> Conv1d(128,1024,1)] fused to one 128x1024 matmul,
#   tiled over output channels (parallel axis for both v7x TCs) with a running
#   (1, TC) max over N tiles.  The (N, 1024) activation never leaves VMEM.
#   The tiny mlp2 head runs in plain XLA afterwards.
# --------------------------------------------------------------------------
def _stage2_pool_kernel(x_ref, w, b, o_ref, gmax_ref):
    n = pl.program_id(2)
    x = x_ref[0]                                                     # (TN, 128) bf16
    z = jnp.dot(x, w[...], preferred_element_type=jnp.float32) + b[...]   # (TN, TC) f32
    tile_max = jnp.max(z, axis=0, keepdims=True)                     # (1, TC)

    @pl.when(n == 0)
    def _():
        gmax_ref[...] = tile_max

    @pl.when(n > 0)
    def _():
        gmax_ref[...] = jnp.maximum(gmax_ref[...], tile_max)

    @pl.when(n == pl.num_programs(2) - 1)
    def _():
        o_ref[0] = gmax_ref[...]


def stage2_pool(x, p):
    B, N, Cin = x.shape
    C2 = p["stage2_w"].shape[1]                                      # 1024
    tc = C2
    for cand in (512, 256, 128):
        if C2 % cand == 0:
            tc = cand
            break
    tn = _tile(N, 256)
    return pl.pallas_call(
        _stage2_pool_kernel,
        out_shape=jax.ShapeDtypeStruct((B, 1, C2), jnp.float32),
        grid=(B, C2 // tc, N // tn),
        in_specs=[pl.BlockSpec((1, tn, Cin), lambda b, c, n: (b, n, 0)),
                  pl.BlockSpec((Cin, tc), lambda b, c, n: (0, c)),
                  pl.BlockSpec((1, tc), lambda b, c, n: (0, c))],
        out_specs=pl.BlockSpec((1, 1, tc), lambda b, c, n: (b, 0, c)),
        scratch_shapes=[pltpu.VMEM((1, tc), jnp.float32)],
        compiler_params=pltpu.CompilerParams(
            dimension_semantics=("parallel", "parallel", "arbitrary"),
            vmem_limit_bytes=_VMEM_LIMIT),
    )(x, p["stage2_w"], p["stage2_b"])


# --------------------------------------------------------------------------
# Weight preparation: algebraic Linear->Conv fusion (exact in f32) + bf16 cast.
# --------------------------------------------------------------------------
def prepare_params(params):
    f32 = jnp.float32
    p = {}
    for name in ("mlp1_w1", "mlp1_w2", "mlp1_w3", "mlp2_w1", "mlp2_w2"):
        p[name] = _bf16(params[name])
    for name in ("mlp1_b1", "mlp1_b2", "mlp1_b3", "mlp2_b1", "mlp2_b2"):
        p[name] = params[name].astype(f32)
    # stage1: (x @ Wl + bl) @ Wc + bc == x @ (Wl@Wc) + (bl@Wc + bc)
    w1f = params["linear1_w"].astype(f32) @ params["conv1_w"].astype(f32)
    b1f = params["linear1_b"].astype(f32) @ params["conv1_w"].astype(f32) + params["conv1_b"]
    p["stage1_w"], p["stage1_b"] = _bf16(w1f), b1f
    # stage2: same fusion for linear2 -> conv2
    w2f = params["linear2_w"].astype(f32) @ params["conv2_w"].astype(f32)
    b2f = params["linear2_b"].astype(f32) @ params["conv2_w"].astype(f32) + params["conv2_b"]
    p["stage2_w"], p["stage2_b"] = _bf16(w2f), b2f
    return p


def _mlp2_head(g, p):
    """Conv1d(1024,F,1)+ReLU -> Conv1d(F,F,1) on the (B,1,1024) pooled feature.
    M=1 matmuls -- kept in plain XLA (same code path in kernel & reference)."""
    h = jax.nn.relu(jnp.dot(_bf16(g), p["mlp2_w1"],
                            preferred_element_type=jnp.float32) + p["mlp2_b1"])
    return jnp.dot(_bf16(h), p["mlp2_w2"],
                   preferred_element_type=jnp.float32) + p["mlp2_b2"]


# --------------------------------------------------------------------------
# Full forward pass
# --------------------------------------------------------------------------
def encode_with_idx(pts, idx, params):
    p = prepare_params(params)
    x12 = _bf16(_local_cov_features(pts, idx))                       # (B, N, 12)
    x64 = mlp1(x12, p)                                               # (B, N, 64)   bf16
    pooled1 = neighbor_maxpool(x64, idx)                             # (B, N, 64)   bf16
    x128 = graph_stage1(pooled1, p)                                  # (B, N, 128)  bf16
    pooled2 = neighbor_maxpool(x128, idx)                            # (B, N, 128)  bf16
    g = stage2_pool(pooled2, p)                                      # (B, 1, 1024) f32
    return _mlp2_head(g, p)                                          # (B, 1, F)    f32


def foldingnet_encoder(pts, params):
    """pts: (B, n_points, 3) float32 -> (B, 1, feat_dims), matching the PyTorch forward."""
    pts = pts.astype(jnp.float32)
    idx = knn_idx(pts)
    return encode_with_idx(pts, idx, params)


# --------------------------------------------------------------------------
# Deterministic parameter init (weights stored as (C_in, C_out), f32 master)
# --------------------------------------------------------------------------
def init_params(key, feat_dims):
    def lin(k, cin, cout):
        k1, k2 = jax.random.split(k)
        bound = 1.0 / jnp.sqrt(jnp.float32(cin))
        w = jax.random.uniform(k1, (cin, cout), jnp.float32, -bound, bound)
        b = jax.random.uniform(k2, (1, cout), jnp.float32, -bound, bound)
        return w, b

    keys = jax.random.split(key, 9)
    p = {}
    p["mlp1_w1"], p["mlp1_b1"] = lin(keys[0], 12, 64)
    p["mlp1_w2"], p["mlp1_b2"] = lin(keys[1], 64, 64)
    p["mlp1_w3"], p["mlp1_b3"] = lin(keys[2], 64, 64)
    p["linear1_w"], p["linear1_b"] = lin(keys[3], 64, 64)
    p["conv1_w"], p["conv1_b"] = lin(keys[4], 64, 128)
    p["linear2_w"], p["linear2_b"] = lin(keys[5], 128, 128)
    p["conv2_w"], p["conv2_b"] = lin(keys[6], 128, 1024)
    p["mlp2_w1"], p["mlp2_b1"] = lin(keys[7], 1024, feat_dims)
    p["mlp2_w2"], p["mlp2_b2"] = lin(keys[8], feat_dims, feat_dims)
    return p


# --------------------------------------------------------------------------
# Pure-JAX reference with the same fused weights + bf16/f32 mixed precision
# (shares idx with the kernel path so neighbor selection is identical).
# --------------------------------------------------------------------------
def reference_encode_with_idx(pts, idx, params):
    p = prepare_params(params)

    def mm(a, w):
        return jnp.dot(_bf16(a), w, preferred_element_type=jnp.float32)

    x = _local_cov_features(pts, idx)                                # (B, N, 12)
    x = jax.nn.relu(mm(x, p["mlp1_w1"]) + p["mlp1_b1"])
    x = jax.nn.relu(mm(x, p["mlp1_w2"]) + p["mlp1_b2"])
    x = _bf16(jax.nn.relu(mm(x, p["mlp1_w3"]) + p["mlp1_b3"]))
    x = neighbor_maxpool(x, idx)
    x = _bf16(jax.nn.relu(mm(x, p["stage1_w"]) + p["stage1_b"]))
    x = neighbor_maxpool(x, idx)
    x = mm(x, p["stage2_w"]) + p["stage2_b"]                         # (B, N, 1024)
    g = jnp.max(x, axis=1, keepdims=True)                            # (B, 1, 1024)
    return _mlp2_head(g, p)                                          # (B, 1, F)


if __name__ == "__main__":
    B, N, feat_dims = 2, 32, 32
    key = jax.random.PRNGKey(0)
    kp, kx = jax.random.split(key)

    params = init_params(kp, feat_dims)
    pts = jax.random.normal(kx, (B, N, 3), jnp.float32)

    # --- kNN kernel (in-kernel top-k, exact f32 scores) ---
    idx = jax.block_until_ready(jax.jit(knn_idx)(pts))
    assert idx.shape == (B, N, K), idx.shape

    # Value-based sanity check of the in-kernel selection (robust to tie order).
    d2 = jnp.sum((pts[:, :, None, :] - pts[:, None, :, :]) ** 2, axis=-1)      # (B, N, N)
    sel_d = jnp.sort(jnp.take_along_axis(d2, idx, axis=-1), axis=-1)
    ref_d = -lax.top_k(-d2, K)[0]
    assert bool(jnp.allclose(sel_d, ref_d, rtol=1e-4, atol=1e-4)), "kNN selection mismatch"

    # --- full encoder ---
    feat = jax.block_until_ready(jax.jit(encode_with_idx)(pts, idx, params))
    assert feat.shape == (B, 1, feat_dims), feat.shape
    assert bool(jnp.all(jnp.isfinite(feat)))

    ref = jax.block_until_ready(reference_encode_with_idx(pts, idx, params))
    if not bool(jnp.allclose(feat, ref, rtol=2e-2, atol=2e-2)):
        raise AssertionError(
            f"mismatch, max abs err = {float(jnp.max(jnp.abs(feat - ref)))}")

    print("KERNEL_OK")
</pallas_src>

<mosaic_0001>
module attributes {stable_mosaic.version = 11 : i64} {
  func.func @_knn_kernel(%arg0: i32, %arg1: i32, %arg2: memref<1x32x3xf32, #tpu.memory_space<vmem>>, %arg3: memref<1x3x32xf32, #tpu.memory_space<vmem>>, %arg4: memref<1x1x32xf32, #tpu.memory_space<vmem>>, %arg5: memref<1x32x16xi32, #tpu.memory_space<vmem>>) attributes {dimension_semantics = [#tpu.dimension_semantics<parallel>, #tpu.dimension_semantics<parallel>], iteration_bounds = array<i64: 2, 1>, scalar_prefetch = 0 : i64, scratch_operands = 0 : i64, tpu.core_type = #tpu.core_type<tc>, window_params = [{transform_indices = @transform_0, window_bounds = array<i64: 1, 32, 3>}, {transform_indices = @transform_1, window_bounds = array<i64: 1, 3, 32>}, {transform_indices = @transform_2, window_bounds = array<i64: 1, 1, 32>}, {transform_indices = @transform_3, window_bounds = array<i64: 1, 32, 16>}]} {
    %c0 = arith.constant 0 : index
    %c0_0 = arith.constant 0 : index
    %c0_1 = arith.constant 0 : index
    %0 = vector.load %arg2[%c0, %c0_0, %c0_1] : memref<1x32x3xf32, #tpu.memory_space<vmem>>, vector<1x32x3xf32>
    %1 = vector.shape_cast %0 : vector<1x32x3xf32> to vector<32x3xf32>
    %c0_2 = arith.constant 0 : index
    %c0_3 = arith.constant 0 : index
    %c0_4 = arith.constant 0 : index
    %2 = vector.load %arg3[%c0_2, %c0_3, %c0_4] : memref<1x3x32xf32, #tpu.memory_space<vmem>>, vector<1x3x32xf32>
    %3 = vector.shape_cast %2 : vector<1x3x32xf32> to vector<3x32xf32>
    %4 = vector.extract_strided_slice %1 {offsets = [0, 0], sizes = [32, 1], strides = [1, 1]} : vector<32x3xf32> to vector<32x1xf32>
    %5 = vector.extract_strided_slice %3 {offsets = [0, 0], sizes = [1, 32], strides = [1, 1]} : vector<3x32xf32> to vector<1x32xf32>
    %6 = vector.broadcast %4 : vector<32x1xf32> to vector<32x32xf32>
    %7 = vector.broadcast %5 : vector<1x32xf32> to vector<32x32xf32>
    %8 = arith.mulf %6, %7 : vector<32x32xf32>
    %9 = vector.extract_strided_slice %1 {offsets = [0, 1], sizes = [32, 1], strides = [1, 1]} : vector<32x3xf32> to vector<32x1xf32>
    %10 = vector.extract_strided_slice %3 {offsets = [1, 0], sizes = [1, 32], strides = [1, 1]} : vector<3x32xf32> to vector<1x32xf32>
    %11 = vector.broadcast %9 : vector<32x1xf32> to vector<32x32xf32>
    %12 = vector.broadcast %10 : vector<1x32xf32> to vector<32x32xf32>
    %13 = arith.mulf %11, %12 : vector<32x32xf32>
    %14 = arith.addf %8, %13 : vector<32x32xf32>
    %15 = vector.extract_strided_slice %1 {offsets = [0, 2], sizes = [32, 1], strides = [1, 1]} : vector<32x3xf32> to vector<32x1xf32>
    %16 = vector.extract_strided_slice %3 {offsets = [2, 0], sizes = [1, 32], strides = [1, 1]} : vector<3x32xf32> to vector<1x32xf32>
    %17 = vector.broadcast %15 : vector<32x1xf32> to vector<32x32xf32>
    %18 = vector.broadcast %16 : vector<1x32xf32> to vector<32x32xf32>
    %19 = arith.mulf %17, %18 : vector<32x32xf32>
    %20 = arith.addf %14, %19 : vector<32x32xf32>
    %cst = arith.constant 2.000000e+00 : f32
    %21 = vector.broadcast %cst : f32 to vector<32x32xf32>
    %22 = arith.mulf %21, %20 : vector<32x32xf32>
    %c0_5 = arith.constant 0 : index
    %c0_6 = arith.constant 0 : index
    %c0_7 = arith.constant 0 : index
    %23 = vector.load %arg4[%c0_5, %c0_6, %c0_7] : memref<1x1x32xf32, #tpu.memory_space<vmem>>, vector<1x1x32xf32>
    %24 = vector.shape_cast %23 : vector<1x1x32xf32> to vector<1x32xf32>
    %25 = vector.broadcast %24 : vector<1x32xf32> to vector<32x32xf32>
    %26 = arith.addf %22, %25 : vector<32x32xf32>
    %27 = tpu.iota {dimensions = array<i32: 1>} : vector<32x32xi32>
    %28 = arith.sitofp %27 : vector<32x32xi32> to vector<32x32xf32>
    %cst_8 = arith.constant dense<0xFF800000> : vector<32xf32>
    %29 = vector.multi_reduction <maximumf>, %26, %cst_8 [1] : vector<32x32xf32> to vector<32xf32>
    %30 = vector.shape_cast %29 : vector<32xf32> to vector<32x1xf32>
    %31 = vector.broadcast %30 : vector<32x1xf32> to vector<32x32xf32>
    %32 = arith.cmpf oge, %26, %31 : vector<32x32xf32>
    %cst_9 = arith.constant 3.200000e+01 : f32
    %33 = vector.broadcast %cst_9 : f32 to vector<32x32xf32>
    %34 = arith.select %32, %28, %33 : vector<32x32xi1>, vector<32x32xf32>
    %cst_10 = arith.constant dense<0x7F800000> : vector<32xf32>
    %35 = vector.multi_reduction <minimumf>, %34, %cst_10 [1] : vector<32x32xf32> to vector<32xf32>
    %36 = vector.shape_cast %35 : vector<32xf32> to vector<32x1xf32>
    %37 = vector.broadcast %36 : vector<32x1xf32> to vector<32x32xf32>
    %38 = arith.cmpf oeq, %28, %37 : vector<32x32xf32>
    %cst_11 = arith.constant 0xFF800000 : f32
    %39 = vector.broadcast %cst_11 : f32 to vector<32x32xf32>
    %40 = arith.select %38, %39, %26 : vector<32x32xi1>, vector<32x32xf32>
    %cst_12 = arith.constant dense<0xFF800000> : vector<32xf32>
    %41 = vector.multi_reduction <maximumf>, %40, %cst_12 [1] : vector<32x32xf32> to vector<32xf32>
    %42 = vector.shape_cast %41 : vector<32xf32> to vector<32x1xf32>
    %43 = vector.broadcast %42 : vector<32x1xf32> to vector<32x32xf32>
    %44 = arith.cmpf oge, %40, %43 : vector<32x32xf32>
    %cst_13 = arith.constant 3.200000e+01 : f32
    %45 = vector.broadcast %cst_13 : f32 to vector<32x32xf32>
    %46 = arith.select %44, %28, %45 : vector<32x32xi1>, vector<32x32xf32>
    %cst_14 = arith.constant dense<0x7F800000> : vector<32xf32>
    %47 = vector.multi_reduction <minimumf>, %46, %cst_14 [1] : vector<32x32xf32> to vector<32xf32>
    %48 = vector.shape_cast %47 : vector<32xf32> to vector<32x1xf32>
    %49 = vector.broadcast %48 : vector<32x1xf32> to vector<32x32xf32>
    %50 = arith.cmpf oeq, %28, %49 : vector<32x32xf32>
    %cst_15 = arith.constant 0xFF800000 : f32
    %51 = vector.broadcast %cst_15 : f32 to vector<32x32xf32>
    %52 = arith.select %50, %51, %40 : vector<32x32xi1>, vector<32x32xf32>
    %cst_16 = arith.constant dense<0xFF800000> : vector<32xf32>
    %53 = vector.multi_reduction <maximumf>, %52, %cst_16 [1] : vector<32x32xf32> to vector<32xf32>
    %54 = vector.shape_cast %53 : vector<32xf32> to vector<32x1xf32>
    %55 = vector.broadcast %54 : vector<32x1xf32> to vector<32x32xf32>
    %56 = arith.cmpf oge, %52, %55 : vector<32x32xf32>
    %cst_17 = arith.constant 3.200000e+01 : f32
    %57 = vector.broadcast %cst_17 : f32 to vector<32x32xf32>
    %58 = arith.select %56, %28, %57 : vector<32x32xi1>, vector<32x32xf32>
    %cst_18 = arith.constant dense<0x7F800000> : vector<32xf32>
    %59 = vector.multi_reduction <minimumf>, %58, %cst_18 [1] : vector<32x32xf32> to vector<32xf32>
    %60 = vector.shape_cast %59 : vector<32xf32> to vector<32x1xf32>
    %61 = vector.broadcast %60 : vector<32x1xf32> to vector<32x32xf32>
    %62 = arith.cmpf oeq, %28, %61 : vector<32x32xf32>
    %cst_19 = arith.constant 0xFF800000 : f32
    %63 = vector.broadcast %cst_19 : f32 to vector<32x32xf32>
    %64 = arith.select %62, %63, %52 : vector<32x32xi1>, vector<32x32xf32>
    %cst_20 = arith.constant dense<0xFF800000> : vector<32xf32>
    %65 = vector.multi_reduction <maximumf>, %64, %cst_20 [1] : vector<32x32xf32> to vector<32xf32>
    %66 = vector.shape_cast %65 : vector<32xf32> to vector<32x1xf32>
    %67 = vector.broadcast %66 : vector<32x1xf32> to vector<32x32xf32>
    %68 = arith.cmpf oge, %64, %67 : vector<32x32xf32>
    %cst_21 = arith.constant 3.200000e+01 : f32
    %69 = vector.broadcast %cst_21 : f32 to vector<32x32xf32>
    %70 = arith.select %68, %28, %69 : vector<32x32xi1>, vector<32x32xf32>
    %cst_22 = arith.constant dense<0x7F800000> : vector<32xf32>
    %71 = vector.multi_reduction <minimumf>, %70, %cst_22 [1] : vector<32x32xf32> to vector<32xf32>
    %72 = vector.shape_cast %71 : vector<32xf32> to vector<32x1xf32>
    %73 = vector.broadcast %72 : vector<32x1xf32> to vector<32x32xf32>
    %74 = arith.cmpf oeq, %28, %73 : vector<32x32xf32>
    %cst_23 = arith.constant 0xFF800000 : f32
    %75 = vector.broadcast %cst_23 : f32 to vector<32x32xf32>
    %76 = arith.select %74, %75, %64 : vector<32x32xi1>, vector<32x32xf32>
    %cst_24 = arith.constant dense<0xFF800000> : vector<32xf32>
    %77 = vector.multi_reduction <maximumf>, %76, %cst_24 [1] : vector<32x32xf32> to vector<32xf32>
    %78 = vector.shape_cast %77 : vector<32xf32> to vector<32x1xf32>
    %79 = vector.broadcast %78 : vector<32x1xf32> to vector<32x32xf32>
    %80 = arith.cmpf oge, %76, %79 : vector<32x32xf32>
    %cst_25 = arith.constant 3.200000e+01 : f32
    %81 = vector.broadcast %cst_25 : f32 to vector<32x32xf32>
    %82 = arith.select %80, %28, %81 : vector<32x32xi1>, vector<32x32xf32>
    %cst_26 = arith.constant dense<0x7F800000> : vector<32xf32>
    %83 = vector.multi_reduction <minimumf>, %82, %cst_26 [1] : vector<32x32xf32> to vector<32xf32>
    %84 = vector.shape_cast %83 : vector<32xf32> to vector<32x1xf32>
    %85 = vector.broadcast %84 : vector<32x1xf32> to vector<32x32xf32>
    %86 = arith.cmpf oeq, %28, %85 : vector<32x32xf32>
    %cst_27 = arith.constant 0xFF800000 : f32
    %87 = vector.broadcast %cst_27 : f32 to vector<32x32xf32>
    %88 = arith.select %86, %87, %76 : vector<32x32xi1>, vector<32x32xf32>
    %cst_28 = arith.constant dense<0xFF800000> : vector<32xf32>
    %89 = vector.multi_reduction <maximumf>, %88, %cst_28 [1] : vector<32x32xf32> to vector<32xf32>
    %90 = vector.shape_cast %89 : vector<32xf32> to vector<32x1xf32>
    %91 = vector.broadcast %90 : vector<32x1xf32> to vector<32x32xf32>
    %92 = arith.cmpf oge, %88, %91 : vector<32x32xf32>
    %cst_29 = arith.constant 3.200000e+01 : f32
    %93 = vector.broadcast %cst_29 : f32 to vector<32x32xf32>
    %94 = arith.select %92, %28, %93 : vector<32x32xi1>, vector<32x32xf32>
    %cst_30 = arith.constant dense<0x7F800000> : vector<32xf32>
    %95 = vector.multi_reduction <minimumf>, %94, %cst_30 [1] : vector<32x32xf32> to vector<32xf32>
    %96 = vector.shape_cast %95 : vector<32xf32> to vector<32x1xf32>
    %97 = vector.broadcast %96 : vector<32x1xf32> to vector<32x32xf32>
    %98 = arith.cmpf oeq, %28, %97 : vector<32x32xf32>
    %cst_31 = arith.constant 0xFF800000 : f32
    %99 = vector.broadcast %cst_31 : f32 to vector<32x32xf32>
    %100 = arith.select %98, %99, %88 : vector<32x32xi1>, vector<32x32xf32>
    %cst_32 = arith.constant dense<0xFF800000> : vector<32xf32>
    %101 = vector.multi_reduction <maximumf>, %100, %cst_32 [1] : vector<32x32xf32> to vector<32xf32>
    %102 = vector.shape_cast %101 : vector<32xf32> to vector<32x1xf32>
    %103 = vector.broadcast %102 : vector<32x1xf32> to vector<32x32xf32>
    %104 = arith.cmpf oge, %100, %103 : vector<32x32xf32>
    %cst_33 = arith.constant 3.200000e+01 : f32
    %105 = vector.broadcast %cst_33 : f32 to vector<32x32xf32>
    %106 = arith.select %104, %28, %105 : vector<32x32xi1>, vector<32x32xf32>
    %cst_34 = arith.constant dense<0x7F800000> : vector<32xf32>
    %107 = vector.multi_reduction <minimumf>, %106, %cst_34 [1] : vector<32x32xf32> to vector<32xf32>
    %108 = vector.shape_cast %107 : vector<32xf32> to vector<32x1xf32>
    %109 = vector.broadcast %108 : vector<32x1xf32> to vector<32x32xf32>
    %110 = arith.cmpf oeq, %28, %109 : vector<32x32xf32>
    %cst_35 = arith.constant 0xFF800000 : f32
    %111 = vector.broadcast %cst_35 : f32 to vector<32x32xf32>
    %112 = arith.select %110, %111, %100 : vector<32x32xi1>, vector<32x32xf32>
    %cst_36 = arith.constant dense<0xFF800000> : vector<32xf32>
    %113 = vector.multi_reduction <maximumf>, %112, %cst_36 [1] : vector<32x32xf32> to vector<32xf32>
    %114 = vector.shape_cast %113 : vector<32xf32> to vector<32x1xf32>
    %115 = vector.broadcast %114 : vector<32x1xf32> to vector<32x32xf32>
    %116 = arith.cmpf oge, %112, %115 : vector<32x32xf32>
    %cst_37 = arith.constant 3.200000e+01 : f32
    %117 = vector.broadcast %cst_37 : f32 to vector<32x32xf32>
    %118 = arith.select %116, %28, %117 : vector<32x32xi1>, vector<32x32xf32>
    %cst_38 = arith.constant dense<0x7F800000> : vector<32xf32>
    %119 = vector.multi_reduction <minimumf>, %118, %cst_38 [1] : vector<32x32xf32> to vector<32xf32>
    %120 = vector.shape_cast %119 : vector<32xf32> to vector<32x1xf32>
    %121 = vector.broadcast %120 : vector<32x1xf32> to vector<32x32xf32>
    %122 = arith.cmpf oeq, %28, %121 : vector<32x32xf32>
    %cst_39 = arith.constant 0xFF800000 : f32
    %123 = vector.broadcast %cst_39 : f32 to vector<32x32xf32>
    %124 = arith.select %122, %123, %112 : vector<32x32xi1>, vector<32x32xf32>
    %cst_40 = arith.constant dense<0xFF800000> : vector<32xf32>
    %125 = vector.multi_reduction <maximumf>, %124, %cst_40 [1] : vector<32x32xf32> to vector<32xf32>
    %126 = vector.shape_cast %125 : vector<32xf32> to vector<32x1xf32>
    %127 = vector.broadcast %126 : vector<32x1xf32> to vector<32x32xf32>
    %128 = arith.cmpf oge, %124, %127 : vector<32x32xf32>
    %cst_41 = arith.constant 3.200000e+01 : f32
    %129 = vector.broadcast %cst_41 : f32 to vector<32x32xf32>
    %130 = arith.select %128, %28, %129 : vector<32x32xi1>, vector<32x32xf32>
    %cst_42 = arith.constant dense<0x7F800000> : vector<32xf32>
    %131 = vector.multi_reduction <minimumf>, %130, %cst_42 [1] : vector<32x32xf32> to vector<32xf32>
    %132 = vector.shape_cast %131 : vector<32xf32> to vector<32x1xf32>
    %133 = vector.broadcast %132 : vector<32x1xf32> to vector<32x32xf32>
    %134 = arith.cmpf oeq, %28, %133 : vector<32x32xf32>
    %cst_43 = arith.constant 0xFF800000 : f32
    %135 = vector.broadcast %cst_43 : f32 to vector<32x32xf32>
    %136 = arith.select %134, %135, %124 : vector<32x32xi1>, vector<32x32xf32>
    %cst_44 = arith.constant dense<0xFF800000> : vector<32xf32>
    %137 = vector.multi_reduction <maximumf>, %136, %cst_44 [1] : vector<32x32xf32> to vector<32xf32>
    %138 = vector.shape_cast %137 : vector<32xf32> to vector<32x1xf32>
    %139 = vector.broadcast %138 : vector<32x1xf32> to vector<32x32xf32>
    %140 = arith.cmpf oge, %136, %139 : vector<32x32xf32>
    %cst_45 = arith.constant 3.200000e+01 : f32
    %141 = vector.broadcast %cst_45 : f32 to vector<32x32xf32>
    %142 = arith.select %140, %28, %141 : vector<32x32xi1>, vector<32x32xf32>
    %cst_46 = arith.constant dense<0x7F800000> : vector<32xf32>
    %143 = vector.multi_reduction <minimumf>, %142, %cst_46 [1] : vector<32x32xf32> to vector<32xf32>
    %144 = vector.shape_cast %143 : vector<32xf32> to vector<32x1xf32>
    %145 = vector.broadcast %144 : vector<32x1xf32> to vector<32x32xf32>
    %146 = arith.cmpf oeq, %28, %145 : vector<32x32xf32>
    %cst_47 = arith.constant 0xFF800000 : f32
    %147 = vector.broadcast %cst_47 : f32 to vector<32x32xf32>
    %148 = arith.select %146, %147, %136 : vector<32x32xi1>, vector<32x32xf32>
    %cst_48 = arith.constant dense<0xFF800000> : vector<32xf32>
    %149 = vector.multi_reduction <maximumf>, %148, %cst_48 [1] : vector<32x32xf32> to vector<32xf32>
    %150 = vector.shape_cast %149 : vector<32xf32> to vector<32x1xf32>
    %151 = vector.broadcast %150 : vector<32x1xf32> to vector<32x32xf32>
    %152 = arith.cmpf oge, %148, %151 : vector<32x32xf32>
    %cst_49 = arith.constant 3.200000e+01 : f32
    %153 = vector.broadcast %cst_49 : f32 to vector<32x32xf32>
    %154 = arith.select %152, %28, %153 : vector<32x32xi1>, vector<32x32xf32>
    %cst_50 = arith.constant dense<0x7F800000> : vector<32xf32>
    %155 = vector.multi_reduction <minimumf>, %154, %cst_50 [1] : vector<32x32xf32> to vector<32xf32>
    %156 = vector.shape_cast %155 : vector<32xf32> to vector<32x1xf32>
    %157 = vector.broadcast %156 : vector<32x1xf32> to vector<32x32xf32>
    %158 = arith.cmpf oeq, %28, %157 : vector<32x32xf32>
    %cst_51 = arith.constant 0xFF800000 : f32
    %159 = vector.broadcast %cst_51 : f32 to vector<32x32xf32>
    %160 = arith.select %158, %159, %148 : vector<32x32xi1>, vector<32x32xf32>
    %cst_52 = arith.constant dense<0xFF800000> : vector<32xf32>
    %161 = vector.multi_reduction <maximumf>, %160, %cst_52 [1] : vector<32x32xf32> to vector<32xf32>
    %162 = vector.shape_cast %161 : vector<32xf32> to vector<32x1xf32>
    %163 = vector.broadcast %162 : vector<32x1xf32> to vector<32x32xf32>
    %164 = arith.cmpf oge, %160, %163 : vector<32x32xf32>
    %cst_53 = arith.constant 3.200000e+01 : f32
    %165 = vector.broadcast %cst_53 : f32 to vector<32x32xf32>
    %166 = arith.select %164, %28, %165 : vector<32x32xi1>, vector<32x32xf32>
    %cst_54 = arith.constant dense<0x7F800000> : vector<32xf32>
    %167 = vector.multi_reduction <minimumf>, %166, %cst_54 [1] : vector<32x32xf32> to vector<32xf32>
    %168 = vector.shape_cast %167 : vector<32xf32> to vector<32x1xf32>
    %169 = vector.broadcast %168 : vector<32x1xf32> to vector<32x32xf32>
    %170 = arith.cmpf oeq, %28, %169 : vector<32x32xf32>
    %cst_55 = arith.constant 0xFF800000 : f32
    %171 = vector.broadcast %cst_55 : f32 to vector<32x32xf32>
    %172 = arith.select %170, %171, %160 : vector<32x32xi1>, vector<32x32xf32>
    %cst_56 = arith.constant dense<0xFF800000> : vector<32xf32>
    %173 = vector.multi_reduction <maximumf>, %172, %cst_56 [1] : vector<32x32xf32> to vector<32xf32>
    %174 = vector.shape_cast %173 : vector<32xf32> to vector<32x1xf32>
    %175 = vector.broadcast %174 : vector<32x1xf32> to vector<32x32xf32>
    %176 = arith.cmpf oge, %172, %175 : vector<32x32xf32>
    %cst_57 = arith.constant 3.200000e+01 : f32
    %177 = vector.broadcast %cst_57 : f32 to vector<32x32xf32>
    %178 = arith.select %176, %28, %177 : vector<32x32xi1>, vector<32x32xf32>
    %cst_58 = arith.constant dense<0x7F800000> : vector<32xf32>
    %179 = vector.multi_reduction <minimumf>, %178, %cst_58 [1] : vector<32x32xf32> to vector<32xf32>
    %180 = vector.shape_cast %179 : vector<32xf32> to vector<32x1xf32>
    %181 = vector.broadcast %180 : vector<32x1xf32> to vector<32x32xf32>
    %182 = arith.cmpf oeq, %28, %181 : vector<32x32xf32>
    %cst_59 = arith.constant 0xFF800000 : f32
    %183 = vector.broadcast %cst_59 : f32 to vector<32x32xf32>
    %184 = arith.select %182, %183, %172 : vector<32x32xi1>, vector<32x32xf32>
    %cst_60 = arith.constant dense<0xFF800000> : vector<32xf32>
    %185 = vector.multi_reduction <maximumf>, %184, %cst_60 [1] : vector<32x32xf32> to vector<32xf32>
    %186 = vector.shape_cast %185 : vector<32xf32> to vector<32x1xf32>
    %187 = vector.broadcast %186 : vector<32x1xf32> to vector<32x32xf32>
    %188 = arith.cmpf oge, %184, %187 : vector<32x32xf32>
    %cst_61 = arith.constant 3.200000e+01 : f32
    %189 = vector.broadcast %cst_61 : f32 to vector<32x32xf32>
    %190 = arith.select %188, %28, %189 : vector<32x32xi1>, vector<32x32xf32>
    %cst_62 = arith.constant dense<0x7F800000> : vector<32xf32>
    %191 = vector.multi_reduction <minimumf>, %190, %cst_62 [1] : vector<32x32xf32> to vector<32xf32>
    %192 = vector.shape_cast %191 : vector<32xf32> to vector<32x1xf32>
    %193 = vector.broadcast %192 : vector<32x1xf32> to vector<32x32xf32>
    %194 = arith.cmpf oeq, %28, %193 : vector<32x32xf32>
    %cst_63 = arith.constant 0xFF800000 : f32
    %195 = vector.broadcast %cst_63 : f32 to vector<32x32xf32>
    %196 = arith.select %194, %195, %184 : vector<32x32xi1>, vector<32x32xf32>
    %cst_64 = arith.constant dense<0xFF800000> : vector<32xf32>
    %197 = vector.multi_reduction <maximumf>, %196, %cst_64 [1] : vector<32x32xf32> to vector<32xf32>
    %198 = vector.shape_cast %197 : vector<32xf32> to vector<32x1xf32>
    %199 = vector.broadcast %198 : vector<32x1xf32> to vector<32x32xf32>
    %200 = arith.cmpf oge, %196, %199 : vector<32x32xf32>
    %cst_65 = arith.constant 3.200000e+01 : f32
    %201 = vector.broadcast %cst_65 : f32 to vector<32x32xf32>
    %202 = arith.select %200, %28, %201 : vector<32x32xi1>, vector<32x32xf32>
    %cst_66 = arith.constant dense<0x7F800000> : vector<32xf32>
    %203 = vector.multi_reduction <minimumf>, %202, %cst_66 [1] : vector<32x32xf32> to vector<32xf32>
    %204 = vector.shape_cast %203 : vector<32xf32> to vector<32x1xf32>
    %205 = vector.broadcast %204 : vector<32x1xf32> to vector<32x32xf32>
    %206 = arith.cmpf oeq, %28, %205 : vector<32x32xf32>
    %cst_67 = arith.constant 0xFF800000 : f32
    %207 = vector.broadcast %cst_67 : f32 to vector<32x32xf32>
    %208 = arith.select %206, %207, %196 : vector<32x32xi1>, vector<32x32xf32>
    %cst_68 = arith.constant dense<0xFF800000> : vector<32xf32>
    %209 = vector.multi_reduction <maximumf>, %208, %cst_68 [1] : vector<32x32xf32> to vector<32xf32>
    %210 = vector.shape_cast %209 : vector<32xf32> to vector<32x1xf32>
    %211 = vector.broadcast %210 : vector<32x1xf32> to vector<32x32xf32>
    %212 = arith.cmpf oge, %208, %211 : vector<32x32xf32>
    %cst_69 = arith.constant 3.200000e+01 : f32
    %213 = vector.broadcast %cst_69 : f32 to vector<32x32xf32>
    %214 = arith.select %212, %28, %213 : vector<32x32xi1>, vector<32x32xf32>
    %cst_70 = arith.constant dense<0x7F800000> : vector<32xf32>
    %215 = vector.multi_reduction <minimumf>, %214, %cst_70 [1] : vector<32x32xf32> to vector<32xf32>
    %216 = vector.shape_cast %215 : vector<32xf32> to vector<32x1xf32>
    %217 = tpu.concatenate %36, %48, %60, %72, %84, %96, %108, %120, %132, %144, %156, %168, %180, %192, %204, %216 in 1 : vector<32x1xf32>, vector<32x1xf32>, vector<32x1xf32>, vector<32x1xf32>, vector<32x1xf32>, vector<32x1xf32>, vector<32x1xf32>, vector<32x1xf32>, vector<32x1xf32>, vector<32x1xf32>, vector<32x1xf32>, vector<32x1xf32>, vector<32x1xf32>, vector<32x1xf32>, vector<32x1xf32>, vector<32x1xf32> -> vector<32x16xf32>
    %218 = arith.fptosi %217 : vector<32x16xf32> to vector<32x16xi32>
    %c0_71 = arith.constant 0 : index
    %c0_72 = arith.constant 0 : index
    %c0_73 = arith.constant 0 : index
    %219 = vector.load %arg5[%c0_71, %c0_72, %c0_73] : memref<1x32x16xi32, #tpu.memory_space<vmem>>, vector<1x32x16xi32>
    %220 = vector.shape_cast %219 : vector<1x32x16xi32> to vector<32x16xi32>
    %221 = vector.shape_cast %218 : vector<32x16xi32> to vector<1x32x16xi32>
    tpu.vector_store %arg5[%c0_71, %c0_72, %c0_73], %221 {strides = array<i32>} : memref<1x32x16xi32, #tpu.memory_space<vmem>>, vector<1x32x16xi32>,
    return
  }
  func.func @transform_0(%arg0: i32, %arg1: i32) -> (i32, i32, i32) {
    %c0_i32 = arith.constant 0 : i32
    %c0_i32_0 = arith.constant 0 : i32
    return %arg0, %arg1, %c0_i32 : i32, i32, i32
  }
  func.func @transform_1(%arg0: i32, %arg1: i32) -> (i32, i32, i32) {
    %c0_i32 = arith.constant 0 : i32
    %c0_i32_0 = arith.constant 0 : i32
    %c0_i32_1 = arith.constant 0 : i32
    return %arg0, %c0_i32, %c0_i32_0 : i32, i32, i32
  }
  func.func @transform_2(%arg0: i32, %arg1: i32) -> (i32, i32, i32) {
    %c0_i32 = arith.constant 0 : i32
    %c0_i32_0 = arith.constant 0 : i32
    %c0_i32_1 = arith.constant 0 : i32
    return %arg0, %c0_i32, %c0_i32_0 : i32, i32, i32
  }
  func.func @transform_3(%arg0: i32, %arg1: i32) -> (i32, i32, i32) {
    %c0_i32 = arith.constant 0 : i32
    %c0_i32_0 = arith.constant 0 : i32
    return %arg0, %arg1, %c0_i32 : i32, i32, i32
  }
}

</mosaic_0001>

<bundles_post_ra>
// kernel: neg.8
= control target key start
LH: loop header
LB: loop body
LE: loop exit
PB: predicated region body
PF: predicated region fallthrough
CT: control target
= control target key end

     0   :  { %s24_s0 = inlined_call_operand.vmem [shape: f32[2,32], index: 0, kind: input, shape index: {}]   ;;  %s25_s1 = inlined_call_operand.vmem [shape: f32[2,32], index: 1, kind: output, shape index: {}]  }
   0x1   :  { %v2_v0 = vld [vmem:[%s24_s0] sm:$0x3] }
   0x2   :  { %v5_v1 = vxor.u32 2147483648, %v2_v0 }
   0x4   :  { %7 = vst [vmem:[%s25_s1] sm:$0x3] %v5_v1 }

// kernel: knn_idx.1
= control target key start
LH: loop header
LB: loop body
LE: loop exit
PB: predicated region body
PF: predicated region fallthrough
CT: control target
= control target key end

     0   :  { %s1276_s12 = smov 0   ;;  %s1278_s13 = smov 0   ;;  %s1794_s0 = inlined_call_operand.vmem [shape: f32[2,32,3], index: 0, kind: input, shape index: {}]   ;;  %s1795_s1 = inlined_call_operand.vmem [shape: f32[2,3,32], index: 1, kind: input, shape index: {}]   ;;  %s1796_s2 = inlined_call_operand.vmem [shape: f32[2,1,32], index: 2, kind: input, shape index: {}]   ;;  %s1797_s3 = inlined_call_operand.vmem [shape: s32[2,32,16], index: 3, kind: output, shape index: {}]  }
   0x1   :  { %s1280_s14 = smov 0  }
   0x2 LB: > { %s25_s15 = sadd.s32 1, %s1247_s13  ;;  %p1177_p0 = scmp.ge.s32.totalorder %s1251_s14, 1  ;;  %s1251_s14 = sphi %s1280_s14, %s13_s14   ;;  %s1247_s13 = sphi %s1278_s13, %s1808_s13   ;;  %s1243_s12 = sphi %s1276_s12, %s1807_s12  }
   0x3   : > { %p27_p1 = scmp.ge.s32.totalorder %s25_s15, 2  ;;  %p175_p2 = scmp.lt.s32.totalorder %s1251_s14, 3 }
   0x5   : > { %s1810_s15 = smov (%p27_p1, %s25_s15), 0  ;;  %p176_p3 = pnand %p1177_p0, %p175_p2 }
   0x6   : > { %p215_p4 = scmp.lt.s32.totalorder (!%p176_p3), %s1243_s12, 1  ;;  %v1253_v0 = vmov (!%p176_p3), 0   ;;  %v1254_v5 = vmov (!%p176_p3), 1   ;;  %v1255_v6 = vmov (!%p176_p3), 2   ;;  %v266_v7 = vlaneseq (!%p176_p3) }
   0x7   : > { %179 = sbr.rel (%p176_p3) target bundleno = 4824 (0x12d8), region = 32  ;;  %1224 = vset.pattern.permute.xlu1 (!%p176_p3), %v1253_v0  ;;  %1223 = vset.pattern.permute.xlu0 (!%p176_p3), %v1253_v0  ;;  %vm348_vm0 = vcmask (!%p176_p3), 261120  }
   0x8   : > { %v267_v10 = vshrl.u32 (!%p176_p3), %v266_v7, 7  ;;  %v346_v61 = vand.u32 (!%p176_p3), 127, %v266_v7 }
   0xa   : > { %v292_v13 = vsub.s32 (!%p176_p3), 1, %v267_v10  ;;  %v268_v17 = vsub.s32 (!%p176_p3), 0, %v267_v10  ;;  %v320_v19 = vsub.s32 (!%p176_p3), 2, %v267_v10  ;;  %v1314_v62 = vcvt.s32.f32 (!%p176_p3), %v346_v61 }
   0xe   : > { %s1812_s12 = smov (!%p215_p4, %s1243_s12), 1 }
   0xf   : > { %s1186_s16 = sshll.u32 %s1812_s12, 5  ;;  %s1180_s20 = sshll.u32 %s1812_s12, 2 }
  0x10   : > { %s222_s19 = scalar_lea.vmem %s1794_s0, %s1186_s16  ;;  %s227_s23 = scalar_lea.vmem %s1795_s1, %s1180_s20 }
  0x11   : > { %v243_v1 = vld [vmem:[%s222_s19 + $0x10] sm:$0xff]  ;;  %v241_v2 = vld [vmem:[%s222_s19] sm:$0xff]  ;;  %v244_v3 = vld [vmem:[%s222_s19 + $0x18] sm:$0xff]  ;;  %s230_s26 = scalar_lea.vmem %s1796_s2, %s1812_s12  ;;  %s239_s29 = scalar_lea.vmem %s1797_s3, %s1186_s16 }
  0x12   : > { %258 = vperm.xlu1 %1224, %v243_v1   ;;  %248 = vperm.xlu0 %1223, %v241_v2   ;;  %v242_v4 = vld [vmem:[%s222_s19 + $0x8] sm:$0xff]  ;;  %v245_v14 = vld [vmem:[%s227_s23] sm:$0x7] }
  0x13   : > { %v293_v18 = vrot.slane %v245_v14, %v292_v13  ;;  %v269_v22 = vrot.slane %v245_v14, %v268_v17  ;;  %v321_v25 = vrot.slane %v245_v14, %v320_v19  ;;  %v1183_v40 = vld [vmem:[%s230_s26] ss:$0 sm:$0xff] }
  0x16   : > { %263 = vperm.xlu1 %1224, %v244_v3   ;;  %253 = vperm.xlu0 %1223, %v242_v4  }
  0x1a   : > { %1226 = vset.pattern.permute.xlu1 %v1254_v5  ;;  %1225 = vset.pattern.permute.xlu0 %v1254_v5 }
  0x1b   : > { %279 = vperm.xlu1 %1226, %v242_v4   ;;  %275 = vperm.xlu0 %1225, %v241_v2  }
  0x1f   : > { %283 = vperm.xlu1 %1226, %v243_v1   ;;  %287 = vperm.xlu0 %1225, %v244_v3  }
  0x23   : > { %1227 = vset.pattern.permute.xlu1 %v1255_v6  ;;  %1228 = vset.pattern.permute.xlu0 %v1255_v6 }
  0x24   : > { %303 = vperm.xlu1 %1227, %v241_v2   ;;  %307 = vperm.xlu0 %1228, %v242_v4  }
  0x28   : > { %311 = vperm.xlu1 %1227, %v243_v1  }
  0x2c   : > { %315 = vperm.xlu1 %1227, %v244_v3  }
  0x91   : > { %v259_v8 = vpop.permute.xlu1 %258  ;;  %v249_v9 = vpop.permute.xlu0 %248 }
  0x92   : > { %v270_v27 = vmul.f32 %v269_v22, %v249_v9  ;;  %v272_v35 = vmul.f32 %v269_v22, %v259_v8 }
  0x95   : > { %v264_v11 = vpop.permute.xlu1 %263  ;;  %v254_v12 = vpop.permute.xlu0 %253 }
  0x96   : > { %v271_v26 = vmul.f32 %v269_v22, %v254_v12  ;;  %v273_v45 = vmul.f32 %v269_v22, %v264_v11 }
  0x9a   : > { %v280_v15 = vpop.permute.xlu1 %279  ;;  %v276_v16 = vpop.permute.xlu0 %275 }
  0x9b   : > { %v295_v23 = vmul.f32 %v293_v18, %v280_v15  ;;  %v294_v24 = vmul.f32 %v293_v18, %v276_v16 }
  0x9d   : > { %v299_v28 = vadd.f32 %v295_v23, %v271_v26  ;;  %v298_v31 = vadd.f32 %v294_v24, %v270_v27 }
  0x9e   : > { %v284_v20 = vpop.permute.xlu1 %283  ;;  %v288_v21 = vpop.permute.xlu0 %287 }
  0x9f   : > { %v296_v32 = vmul.f32 %v293_v18, %v284_v20  ;;  %v297_v38 = vmul.f32 %v293_v18, %v288_v21 }
  0xa1   : > { %v300_v41 = vadd.f32 %v296_v32, %v272_v35  ;;  %v301_v49 = vadd.f32 %v297_v38, %v273_v45 }
  0xa3   : > { %v304_v29 = vpop.permute.xlu1 %303  ;;  %v308_v30 = vpop.permute.xlu0 %307 }
  0xa4   : > { %v322_v33 = vmul.f32 %v321_v25, %v304_v29  ;;  %v323_v34 = vmul.f32 %v321_v25, %v308_v30 }
  0xa6   : > { %v326_v36 = vadd.f32 %v322_v33, %v298_v31  ;;  %v327_v37 = vadd.f32 %v323_v34, %v299_v28 }
  0xa7   : > { %v312_v39 = vpop.permute.xlu1 %311 }
  0xa8   : > { %v330_v42 = vmul.f32 2.0, %v326_v36  ;;  %v331_v43 = vmul.f32 2.0, %v327_v37  ;;  %v324_v44 = vmul.f32 %v321_v25, %v312_v39 }
  0xaa   : > { %v328_v46 = vadd.f32 %v324_v44, %v300_v41  ;;  %v341_v47 = vadd.f32 %v1183_v40, %v330_v42  ;;  %v342_v48 = vadd.f32 %v1183_v40, %v331_v43 }
  0xab   : > { %v316_v50 = vpop.permute.xlu1 %315 }
  0xac   : > { %v332_v51 = vmul.f32 2.0, %v328_v46  ;;  %v325_v52 = vmul.f32 %v321_v25, %v316_v50  ;;  %v349_v53 = vsel %vm348_vm0, %v341_v47, -inf  ;;  %v352_v54 = vsel %vm348_vm0, %v342_v48, -inf }
  0xad   : > { %350 = vmax.xlane.f32.xlu0 %v349_v53  ;;  %353 = vmax.xlane.f32.xlu1 %v352_v54 }
  0xae   : > { %v329_v55 = vadd.f32 %v325_v52, %v301_v49  ;;  %v343_v56 = vadd.f32 %v1183_v40, %v332_v51 }
  0xb0   : > { %v333_v57 = vmul.f32 2.0, %v329_v55  ;;  %v355_v58 = vsel %vm348_vm0, %v343_v56, -inf }
  0xb1   : > { %356 = vmax.xlane.f32.xlu0 %v355_v58 }
  0xb2   : > { %v344_v59 = vadd.f32 %v1183_v40, %v333_v57 }
  0xb4   : > { %v358_v60 = vsel %vm348_vm0, %v344_v59, -inf }
  0xb5   : > { %359 = vmax.xlane.f32.xlu0 %v358_v60 }
 0x13a   : > { %v354_v63 = vpop.xlane.xlu1 %353  ;;  %v351_v0 = vpop.xlane.xlu0 %350 }
 0x13b   : > { %vm362_vm1 = vcmp.ge.f32.partialorder %v342_v48, %v354_v63  ;;  %vm361_vm2 = vcmp.ge.f32.partialorder %v341_v47, %v351_v0 }
 0x13c   : > { %v366_v1 = vsel %vm362_vm1, %v1314_v62, 32.0  ;;  %v365_v2 = vsel %vm361_vm2, %v1314_v62, 32.0 }
 0x13d   : > { %v372_v3 = vsel %vm348_vm0, %v366_v1, inf  ;;  %v369_v4 = vsel %vm348_vm0, %v365_v2, inf }
 0x13e   : > { %373 = vmin.xlane.f32.xlu0 %v372_v3  ;;  %370 = vmin.xlane.f32.xlu1 %v369_v4  ;;  %v357_v5 = vpop.xlane.xlu0 %356 }
 0x13f   : > { %vm363_vm3 = vcmp.ge.f32.partialorder %v343_v56, %v357_v5 }
 0x140   : > { %v367_v6 = vsel %vm363_vm3, %v1314_v62, 32.0 }
 0x141   : > { %v375_v7 = vsel %vm348_vm0, %v367_v6, inf }
 0x142   : > { %376 = vmin.xlane.f32.xlu1 %v375_v7  ;;  %v360_v8 = vpop.xlane.xlu0 %359 }
 0x143   : > { %vm364_vm4 = vcmp.ge.f32.partialorder %v344_v59, %v360_v8 }
 0x144   : > { %v368_v9 = vsel %vm364_vm4, %v1314_v62, 32.0 }
 0x145   : > { %v378_v10 = vsel %vm348_vm0, %v368_v9, inf }
 0x146   : > { %379 = vmin.xlane.f32.xlu0 %v378_v10 }
 0x1cb   : > { %v1324_v11 = vpop.xlane.xlu1 %370  ;;  %v1326_v12 = vpop.xlane.xlu0 %373 }
 0x1cc   : > { %vm381_vm5 = vcmp.eq.f32.partialorder %v1314_v62, %v1324_v11  ;;  %vm382_vm6 = vcmp.eq.f32.partialorder %v1314_v62, %v1326_v12 }
 0x1cd   : > { %v385_v13 = vsel %vm381_vm5, -inf, %v341_v47  ;;  %v386_v14 = vsel %vm382_vm6, -inf, %v342_v48 }
 0x1ce   : > { %v389_v15 = vsel %vm348_vm0, %v385_v13, -inf  ;;  %v392_v16 = vsel %vm348_vm0, %v386_v14, -inf }
 0x1cf   : > { %390 = vmax.xlane.f32.xlu1 %v389_v15  ;;  %v1334_v17 = vpop.xlane.xlu1 %376  ;;  %393 = vmax.xlane.f32.xlu0 %v392_v16 }
 0x1d0   : > { %vm383_vm7 = vcmp.eq.f32.partialorder %v1314_v62, %v1334_v17 }
 0x1d1   : > { %v387_v18 = vsel %vm383_vm7, -inf, %v343_v56 }
 0x1d2   : > { %v395_v19 = vsel %vm348_vm0, %v387_v18, -inf }
 0x1d3   : > { %396 = vmax.xlane.f32.xlu1 %v395_v19  ;;  %v1339_v20 = vpop.xlane.xlu0 %379 }
 0x1d4   : > { %vm384_vm8 = vcmp.eq.f32.partialorder %v1314_v62, %v1339_v20 }
 0x1d5   : > { %v388_v21 = vsel %vm384_vm8, -inf, %v344_v59 }
 0x1d6   : > { %v398_v22 = vsel %vm348_vm0, %v388_v21, -inf }
 0x1d7   : > { %399 = vmax.xlane.f32.xlu0 %v398_v22 }
 0x25c   : > { %v391_v23 = vpop.xlane.xlu1 %390  ;;  %v394_v24 = vpop.xlane.xlu0 %393 }
 0x25d   : > { %vm401_vm9 = vcmp.ge.f32.partialorder %v385_v13, %v391_v23  ;;  %vm402_vm10 = vcmp.ge.f32.partialorder %v386_v14, %v394_v24 }
 0x25e   : > { %v405_v25 = vsel %vm401_vm9, %v1314_v62, 32.0  ;;  %v406_v26 = vsel %vm402_vm10, %v1314_v62, 32.0 }
 0x25f   : > { %v409_v27 = vsel %vm348_vm0, %v405_v25, inf  ;;  %v412_v28 = vsel %vm348_vm0, %v406_v26, inf }
 0x260   : > { %410 = vmin.xlane.f32.xlu1 %v409_v27  ;;  %v397_v29 = vpop.xlane.xlu1 %396  ;;  %413 = vmin.xlane.f32.xlu0 %v412_v28 }
 0x261   : > { %vm403_vm11 = vcmp.ge.f32.partialorder %v387_v18, %v397_v29 }
 0x262   : > { %v407_v30 = vsel %vm403_vm11, %v1314_v62, 32.0 }
 0x263   : > { %v415_v31 = vsel %vm348_vm0, %v407_v30, inf }
 0x264   : > { %416 = vmin.xlane.f32.xlu1 %v415_v31  ;;  %v400_v32 = vpop.xlane.xlu0 %399 }
 0x265   : > { %vm404_vm12 = vcmp.ge.f32.partialorder %v388_v21, %v400_v32 }
 0x266   : > { %v408_v33 = vsel %vm404_vm12, %v1314_v62, 32.0 }
 0x267   : > { %v418_v34 = vsel %vm348_vm0, %v408_v33, inf }
 0x268   : > { %419 = vmin.xlane.f32.xlu0 %v418_v34 }
 0x2ed   : > { %v1352_v35 = vpop.xlane.xlu1 %410  ;;  %v1354_v36 = vpop.xlane.xlu0 %413 }
 0x2ee   : > { %vm421_vm13 = vcmp.eq.f32.partialorder %v1314_v62, %v1352_v35  ;;  %vm422_vm14 = vcmp.eq.f32.partialorder %v1314_v62, %v1354_v36 }
 0x2ef   : > { %v425_v37 = vsel %vm421_vm13, -inf, %v385_v13  ;;  %v426_v38 = vsel %vm422_vm14, -inf, %v386_v14 }
 0x2f0   : > { %v429_v39 = vsel %vm348_vm0, %v425_v37, -inf  ;;  %v432_v40 = vsel %vm348_vm0, %v426_v38, -inf }
 0x2f1   : > { %430 = vmax.xlane.f32.xlu1 %v429_v39  ;;  %v1362_v41 = vpop.xlane.xlu1 %416  ;;  %433 = vmax.xlane.f32.xlu0 %v432_v40 }
 0x2f2   : > { %vm423_vm15 = vcmp.eq.f32.partialorder %v1314_v62, %v1362_v41 }
 0x2f3   : > { %v427_v42 = vsel %vm423_vm15, -inf, %v387_v18 }
 0x2f4   : > { %v435_v43 = vsel %vm348_vm0, %v427_v42, -inf }
 0x2f5   : > { %436 = vmax.xlane.f32.xlu1 %v435_v43  ;;  %v1367_v44 = vpop.xlane.xlu0 %419 }
 0x2f6   : > { %vm424_vm1 = vcmp.eq.f32.partialorder %v1314_v62, %v1367_v44 }
 0x2f7   : > { %v428_v45 = vsel %vm424_vm1, -inf, %v388_v21 }
 0x2f8   : > { %v438_v46 = vsel %vm348_vm0, %v428_v45, -inf }
 0x2f9   : > { %439 = vmax.xlane.f32.xlu0 %v438_v46 }
 0x37e   : > { %v431_v47 = vpop.xlane.xlu1 %430  ;;  %v434_v48 = vpop.xlane.xlu0 %433 }
 0x37f   : > { %vm441_vm2 = vcmp.ge.f32.partialorder %v425_v37, %v431_v47  ;;  %vm442_vm3 = vcmp.ge.f32.partialorder %v426_v38, %v434_v48 }
 0x380   : > { %v445_v49 = vsel %vm441_vm2, %v1314_v62, 32.0  ;;  %v446_v50 = vsel %vm442_vm3, %v1314_v62, 32.0 }
 0x381   : > { %v449_v51 = vsel %vm348_vm0, %v445_v49, inf  ;;  %v452_v52 = vsel %vm348_vm0, %v446_v50, inf }
 0x382   : > { %450 = vmin.xlane.f32.xlu1 %v449_v51  ;;  %v437_v53 = vpop.xlane.xlu1 %436  ;;  %453 = vmin.xlane.f32.xlu0 %v452_v52 }
 0x383   : > { %vm443_vm4 = vcmp.ge.f32.partialorder %v427_v42, %v437_v53 }
 0x384   : > { %v447_v54 = vsel %vm443_vm4, %v1314_v62, 32.0 }
 0x385   : > { %v455_v55 = vsel %vm348_vm0, %v447_v54, inf }
 0x386   : > { %456 = vmin.xlane.f32.xlu1 %v455_v55  ;;  %v440_v56 = vpop.xlane.xlu0 %439 }
 0x387   : > { %vm444_vm5 = vcmp.ge.f32.partialorder %v428_v45, %v440_v56 }
 0x388   : > { %v448_v57 = vsel %vm444_vm5, %v1314_v62, 32.0 }
 0x389   : > { %v458_v58 = vsel %vm348_vm0, %v448_v57, inf }
 0x38a   : > { %459 = vmin.xlane.f32.xlu0 %v458_v58 }
 0x40f   : > { %v1380_v59 = vpop.xlane.xlu1 %450  ;;  %v1382_v60 = vpop.xlane.xlu0 %453 }
 0x410   : > { %vm461_vm6 = vcmp.eq.f32.partialorder %v1314_v62, %v1380_v59  ;;  %vm462_vm7 = vcmp.eq.f32.partialorder %v1314_v62, %v1382_v60 }
 0x411   : > { %v465_v61 = vsel %vm461_vm6, -inf, %v425_v37  ;;  %v466_v63 = vsel %vm462_vm7, -inf, %v426_v38 }
 0x412   : > { %v469_v0 = vsel %vm348_vm0, %v465_v61, -inf  ;;  %v472_v1 = vsel %vm348_vm0, %v466_v63, -inf }
 0x413   : > { %470 = vmax.xlane.f32.xlu1 %v469_v0  ;;  %v1390_v2 = vpop.xlane.xlu1 %456  ;;  %473 = vmax.xlane.f32.xlu0 %v472_v1 }
 0x414   : > { %vm463_vm8 = vcmp.eq.f32.partialorder %v1314_v62, %v1390_v2 }
 0x415   : > { %v467_v3 = vsel %vm463_vm8, -inf, %v427_v42 }
 0x416   : > { %v475_v4 = vsel %vm348_vm0, %v467_v3, -inf }
 0x417   : > { %476 = vmax.xlane.f32.xlu1 %v475_v4  ;;  %v1395_v5 = vpop.xlane.xlu0 %459 }
 0x418   : > { %vm464_vm9 = vcmp.eq.f32.partialorder %v1314_v62, %v1395_v5 }
 0x419   : > { %v468_v6 = vsel %vm464_vm9, -inf, %v428_v45 }
 0x41a   : > { %v478_v7 = vsel %vm348_vm0, %v468_v6, -inf }
 0x41b   : > { %479 = vmax.xlane.f32.xlu0 %v478_v7 }
 0x4a0   : > { %v471_v8 = vpop.xlane.xlu1 %470  ;;  %v474_v9 = vpop.xlane.xlu0 %473 }
 0x4a1   : > { %vm481_vm10 = vcmp.ge.f32.partialorder %v465_v61, %v471_v8  ;;  %vm482_vm11 = vcmp.ge.f32.partialorder %v466_v63, %v474_v9 }
 0x4a2   : > { %v485_v10 = vsel %vm481_vm10, %v1314_v62, 32.0  ;;  %v486_v13 = vsel %vm482_vm11, %v1314_v62, 32.0 }
 0x4a3   : > { %v489_v14 = vsel %vm348_vm0, %v485_v10, inf  ;;  %v492_v15 = vsel %vm348_vm0, %v486_v13, inf }
 0x4a4   : > { %490 = vmin.xlane.f32.xlu1 %v489_v14  ;;  %v477_v16 = vpop.xlane.xlu1 %476  ;;  %493 = vmin.xlane.f32.xlu0 %v492_v15 }
 0x4a5   : > { %vm483_vm12 = vcmp.ge.f32.partialorder %v467_v3, %v477_v16 }
 0x4a6   : > { %v487_v18 = vsel %vm483_vm12, %v1314_v62, 32.0 }
 0x4a7   : > { %v495_v19 = vsel %vm348_vm0, %v487_v18, inf }
 0x4a8   : > { %496 = vmin.xlane.f32.xlu1 %v495_v19  ;;  %v480_v21 = vpop.xlane.xlu0 %479 }
 0x4a9   : > { %vm484_vm13 = vcmp.ge.f32.partialorder %v468_v6, %v480_v21 }
 0x4aa   : > { %v488_v22 = vsel %vm484_vm13, %v1314_v62, 32.0 }
 0x4ab   : > { %v498_v23 = vsel %vm348_vm0, %v488_v22, inf }
 0x4ac   : > { %499 = vmin.xlane.f32.xlu0 %v498_v23 }
 0x531   : > { %v1408_v24 = vpop.xlane.xlu1 %490  ;;  %v1410_v25 = vpop.xlane.xlu0 %493 }
 0x532   : > { %vm501_vm14 = vcmp.eq.f32.partialorder %v1314_v62, %v1408_v24  ;;  %vm502_vm15 = vcmp.eq.f32.partialorder %v1314_v62, %v1410_v25 }
 0x533   : > { %v505_v26 = vsel %vm501_vm14, -inf, %v465_v61  ;;  %v506_v27 = vsel %vm502_vm15, -inf, %v466_v63  ;;  %vm981_vm15 = vcmask 7168  }
 0x534   : > { %v509_v28 = vsel %vm348_vm0, %v505_v26, -inf  ;;  %v512_v29 = vsel %vm348_vm0, %v506_v27, -inf  ;;  %v982_v21 = vsel %vm981_vm15, %v1324_v11, %v1352_v35  ;;  %v983_v22 = vsel %vm981_vm15, %v1326_v12, %v1354_v36 }
 0x535   : > { %510 = vmax.xlane.f32.xlu1 %v509_v28  ;;  %v1418_v30 = vpop.xlane.xlu1 %496  ;;  %513 = vmax.xlane.f32.xlu0 %v512_v29 }
 0x536   : > { %vm503_vm1 = vcmp.eq.f32.partialorder %v1314_v62, %v1418_v30 }
 0x537   : > { %v507_v31 = vsel %vm503_vm1, -inf, %v467_v3  ;;  %vm986_vm1 = vcmask 15360  }
 0x538   : > { %v515_v32 = vsel %vm348_vm0, %v507_v31, -inf  ;;  %v987_v23 = vsel %vm986_vm1, %v982_v21, %v1380_v59 }
 0x539   : > { %516 = vmax.xlane.f32.xlu1 %v515_v32  ;;  %v1423_v33 = vpop.xlane.xlu0 %499 }
 0x53a   : > { %vm504_vm2 = vcmp.eq.f32.partialorder %v1314_v62, %v1423_v33 }
 0x53b   : > { %v508_v34 = vsel %vm504_vm2, -inf, %v468_v6  ;;  %vm991_vm2 = vcmask 23552  }
 0x53c   : > { %v518_v37 = vsel %vm348_vm0, %v508_v34, -inf }
 0x53d   : > { %519 = vmax.xlane.f32.xlu0 %v518_v37 }
 0x5c2   : > { %v511_v38 = vpop.xlane.xlu1 %510  ;;  %v514_v39 = vpop.xlane.xlu0 %513 }
 0x5c3   : > { %vm521_vm3 = vcmp.ge.f32.partialorder %v505_v26, %v511_v38  ;;  %vm522_vm4 = vcmp.ge.f32.partialorder %v506_v27, %v514_v39 }
 0x5c4   : > { %v525_v40 = vsel %vm521_vm3, %v1314_v62, 32.0  ;;  %v526_v42 = vsel %vm522_vm4, %v1314_v62, 32.0  ;;  %vm996_vm3 = vcmask 31744   ;;  %vm1001_vm4 = vcmask 39936  }
 0x5c5   : > { %v529_v43 = vsel %vm348_vm0, %v525_v40, inf  ;;  %v532_v45 = vsel %vm348_vm0, %v526_v42, inf }
 0x5c6   : > { %530 = vmin.xlane.f32.xlu1 %v529_v43  ;;  %v517_v46 = vpop.xlane.xlu1 %516  ;;  %533 = vmin.xlane.f32.xlu0 %v532_v45 }
 0x5c7   : > { %vm523_vm5 = vcmp.ge.f32.partialorder %v507_v31, %v517_v46 }
 0x5c8   : > { %v527_v47 = vsel %vm523_vm5, %v1314_v62, 32.0 }
 0x5c9   : > { %v535_v48 = vsel %vm348_vm0, %v527_v47, inf }
 0x5ca   : > { %536 = vmin.xlane.f32.xlu1 %v535_v48  ;;  %v520_v49 = vpop.xlane.xlu0 %519 }
 0x5cb   : > { %vm524_vm6 = vcmp.ge.f32.partialorder %v508_v34, %v520_v49 }
 0x5cc   : > { %v528_v50 = vsel %vm524_vm6, %v1314_v62, 32.0 }
 0x5cd   : > { %v538_v51 = vsel %vm348_vm0, %v528_v50, inf }
 0x5ce   : > { %539 = vmin.xlane.f32.xlu0 %v538_v51 }
 0x653   : > { %v531_v52 = vpop.xlane.xlu1 %530  ;;  %v534_v53 = vpop.xlane.xlu0 %533 }
 0x654   : > { %vm541_vm7 = vcmp.eq.f32.partialorder %v1314_v62, %v531_v52  ;;  %vm542_vm8 = vcmp.eq.f32.partialorder %v1314_v62, %v534_v53 }
 0x655   : > { %v545_v54 = vsel %vm541_vm7, -inf, %v505_v26  ;;  %v546_v55 = vsel %vm542_vm8, -inf, %v506_v27  ;;  %v988_v26 = vsel %vm986_vm1, %v983_v22, %v1382_v60  ;;  %v992_v27 = vsel %vm991_vm2, %v987_v23, %v1408_v24 }
 0x656   : > { %v549_v56 = vsel %vm348_vm0, %v545_v54, -inf  ;;  %v552_v57 = vsel %vm348_vm0, %v546_v55, -inf  ;;  %v993_v28 = vsel %vm991_vm2, %v988_v26, %v1410_v25  ;;  %v997_v11 = vsel %vm996_vm3, %v992_v27, %v531_v52 }
 0x657   : > { %550 = vmax.xlane.f32.xlu1 %v549_v56  ;;  %v1440_v58 = vpop.xlane.xlu1 %536  ;;  %553 = vmax.xlane.f32.xlu0 %v552_v57  ;;  %v998_v35 = vsel %vm996_vm3, %v993_v28, %v534_v53 }
 0x658   : > { %vm543_vm9 = vcmp.eq.f32.partialorder %v1314_v62, %v1440_v58 }
 0x659   : > { %v547_v61 = vsel %vm543_vm9, -inf, %v507_v31 }
 0x65a   : > { %v555_v63 = vsel %vm348_vm0, %v547_v61, -inf }
 0x65b   : > { %556 = vmax.xlane.f32.xlu1 %v555_v63  ;;  %v1445_v0 = vpop.xlane.xlu0 %539 }
 0x65c   : > { %vm544_vm10 = vcmp.eq.f32.partialorder %v1314_v62, %v1445_v0 }
 0x65d   : > { %v548_v1 = vsel %vm544_vm10, -inf, %v508_v34 }
 0x65e   : > { %v558_v3 = vsel %vm348_vm0, %v548_v1, -inf }
 0x65f   : > { %559 = vmax.xlane.f32.xlu0 %v558_v3 }
 0x6e4   : > { %v551_v4 = vpop.xlane.xlu1 %550  ;;  %v554_v6 = vpop.xlane.xlu0 %553 }
 0x6e5   : > { %vm561_vm11 = vcmp.ge.f32.partialorder %v545_v54, %v551_v4  ;;  %vm562_vm12 = vcmp.ge.f32.partialorder %v546_v55, %v554_v6 }
 0x6e6   : > { %v565_v7 = vsel %vm561_vm11, %v1314_v62, 32.0  ;;  %v566_v8 = vsel %vm562_vm12, %v1314_v62, 32.0 }
 0x6e7   : > { %v569_v9 = vsel %vm348_vm0, %v565_v7, inf  ;;  %v572_v10 = vsel %vm348_vm0, %v566_v8, inf }
 0x6e8   : > { %570 = vmin.xlane.f32.xlu1 %v569_v9  ;;  %v557_v13 = vpop.xlane.xlu1 %556  ;;  %573 = vmin.xlane.f32.xlu0 %v572_v10 }
 0x6e9   : > { %vm563_vm13 = vcmp.ge.f32.partialorder %v547_v61, %v557_v13 }
 0x6ea   : > { %v567_v14 = vsel %vm563_vm13, %v1314_v62, 32.0  ;;  %vm1006_vm13 = vcmask 48128  }
 0x6eb   : > { %v575_v15 = vsel %vm348_vm0, %v567_v14, inf }
 0x6ec   : > { %576 = vmin.xlane.f32.xlu1 %v575_v15  ;;  %v560_v16 = vpop.xlane.xlu0 %559 }
 0x6ed   : > { %vm564_vm14 = vcmp.ge.f32.partialorder %v548_v1, %v560_v16 }
 0x6ee   : > { %v568_v18 = vsel %vm564_vm14, %v1314_v62, 32.0 }
 0x6ef   : > { %v578_v19 = vsel %vm348_vm0, %v568_v18, inf }
 0x6f0   : > { %579 = vmin.xlane.f32.xlu0 %v578_v19 }
 0x775   : > { %v571_v29 = vpop.xlane.xlu1 %570  ;;  %v574_v12 = vpop.xlane.xlu0 %573 }
 0x776   : > { %vm581_vm5 = vcmp.eq.f32.partialorder %v1314_v62, %v571_v29  ;;  %v1002_v36 = vsel %vm1001_vm4, %v997_v11, %v571_v29  ;;  %vm582_vm6 = vcmp.eq.f32.partialorder %v1314_v62, %v574_v12  ;;  %v1003_v59 = vsel %vm1001_vm4, %v998_v35, %v574_v12 }
 0x777   : > { %v585_v60 = vsel %vm581_vm5, -inf, %v545_v54  ;;  %v586_v31 = vsel %vm582_vm6, -inf, %v546_v55 }
 0x778   : > { %v589_v24 = vsel %vm348_vm0, %v585_v60, -inf  ;;  %v592_v25 = vsel %vm348_vm0, %v586_v31, -inf }
 0x779   : > { %590 = vmax.xlane.f32.xlu1 %v589_v24  ;;  %v1480_v32 = vpop.xlane.xlu1 %576  ;;  %593 = vmax.xlane.f32.xlu0 %v592_v25 }
 0x77a   : > { %vm583_vm7 = vcmp.eq.f32.partialorder %v1314_v62, %v1480_v32 }
 0x77b   : > { %v587_v34 = vsel %vm583_vm7, -inf, %v547_v61 }
 0x77c   : > { %v595_v37 = vsel %vm348_vm0, %v587_v34, -inf }
 0x77d   : > { %596 = vmax.xlane.f32.xlu1 %v595_v37  ;;  %v1485_v38 = vpop.xlane.xlu0 %579 }
 0x77e   : > { %vm584_vm8 = vcmp.eq.f32.partialorder %v1314_v62, %v1485_v38 }
 0x77f   : > { %v588_v39 = vsel %vm584_vm8, -inf, %v548_v1 }
 0x780   : > { %v598_v40 = vsel %vm348_vm0, %v588_v39, -inf }
 0x781   : > { %599 = vmax.xlane.f32.xlu0 %v598_v40 }
 0x806   : > { %v591_v42 = vpop.xlane.xlu1 %590  ;;  %v594_v43 = vpop.xlane.xlu0 %593 }
 0x807   : > { %vm601_vm9 = vcmp.ge.f32.partialorder %v585_v60, %v591_v42  ;;  %vm602_vm10 = vcmp.ge.f32.partialorder %v586_v31, %v594_v43 }
 0x808   : > { %v605_v45 = vsel %vm601_vm9, %v1314_v62, 32.0  ;;  %v606_v46 = vsel %vm602_vm10, %v1314_v62, 32.0 }
 0x809   : > { %v609_v47 = vsel %vm348_vm0, %v605_v45, inf  ;;  %v612_v48 = vsel %vm348_vm0, %v606_v46, inf }
 0x80a   : > { %610 = vmin.xlane.f32.xlu1 %v609_v47  ;;  %v597_v49 = vpop.xlane.xlu1 %596  ;;  %613 = vmin.xlane.f32.xlu0 %v612_v48 }
 0x80b   : > { %vm603_vm11 = vcmp.ge.f32.partialorder %v587_v34, %v597_v49 }
 0x80c   : > { %v607_v50 = vsel %vm603_vm11, %v1314_v62, 32.0 }
 0x80d   : > { %v615_v51 = vsel %vm348_vm0, %v607_v50, inf }
 0x80e   : > { %616 = vmin.xlane.f32.xlu1 %v615_v51  ;;  %v600_v52 = vpop.xlane.xlu0 %599 }
 0x80f   : > { %vm604_vm12 = vcmp.ge.f32.partialorder %v588_v39, %v600_v52 }
 0x810   : > { %v608_v53 = vsel %vm604_vm12, %v1314_v62, 32.0  ;;  %vm1011_vm12 = vcmask 56320  }
 0x811   : > { %v618_v54 = vsel %vm348_vm0, %v608_v53, inf }
 0x812   : > { %619 = vmin.xlane.f32.xlu0 %v618_v54 }
 0x897   : > { %v611_v55 = vpop.xlane.xlu1 %610  ;;  %v614_v56 = vpop.xlane.xlu0 %613 }
 0x898   : > { %vm621_vm14 = vcmp.eq.f32.partialorder %v1314_v62, %v611_v55  ;;  %v1007_v57 = vsel %vm1006_vm13, %v1002_v36, %v611_v55  ;;  %vm622_vm5 = vcmp.eq.f32.partialorder %v1314_v62, %v614_v56  ;;  %v1008_v61 = vsel %vm1006_vm13, %v1003_v59, %v614_v56 }
 0x899   : > { %v625_v63 = vsel %vm621_vm14, -inf, %v585_v60  ;;  %v626_v1 = vsel %vm622_vm5, -inf, %v586_v31 }
 0x89a   : > { %v629_v3 = vsel %vm348_vm0, %v625_v63, -inf  ;;  %v632_v4 = vsel %vm348_vm0, %v626_v1, -inf }
 0x89b   : > { %630 = vmax.xlane.f32.xlu1 %v629_v3  ;;  %v1504_v6 = vpop.xlane.xlu1 %616  ;;  %633 = vmax.xlane.f32.xlu0 %v632_v4 }
 0x89c   : > { %vm623_vm6 = vcmp.eq.f32.partialorder %v1314_v62, %v1504_v6 }
 0x89d   : > { %v627_v7 = vsel %vm623_vm6, -inf, %v587_v34 }
 0x89e   : > { %v635_v8 = vsel %vm348_vm0, %v627_v7, -inf }
 0x89f   : > { %636 = vmax.xlane.f32.xlu1 %v635_v8  ;;  %v1509_v9 = vpop.xlane.xlu0 %619 }
 0x8a0   : > { %vm624_vm7 = vcmp.eq.f32.partialorder %v1314_v62, %v1509_v9 }
 0x8a1   : > { %v628_v10 = vsel %vm624_vm7, -inf, %v588_v39 }
 0x8a2   : > { %v638_v13 = vsel %vm348_vm0, %v628_v10, -inf }
 0x8a3   : > { %639 = vmax.xlane.f32.xlu0 %v638_v13 }
 0x928   : > { %v631_v14 = vpop.xlane.xlu1 %630  ;;  %v634_v15 = vpop.xlane.xlu0 %633 }
 0x929   : > { %vm641_vm8 = vcmp.ge.f32.partialorder %v625_v63, %v631_v14  ;;  %vm642_vm9 = vcmp.ge.f32.partialorder %v626_v1, %v634_v15 }
 0x92a   : > { %v645_v16 = vsel %vm641_vm8, %v1314_v62, 32.0  ;;  %v646_v18 = vsel %vm642_vm9, %v1314_v62, 32.0 }
 0x92b   : > { %v649_v19 = vsel %vm348_vm0, %v645_v16, inf  ;;  %v652_v21 = vsel %vm348_vm0, %v646_v18, inf }
 0x92c   : > { %650 = vmin.xlane.f32.xlu1 %v649_v19  ;;  %v637_v22 = vpop.xlane.xlu1 %636  ;;  %653 = vmin.xlane.f32.xlu0 %v652_v21 }
 0x92d   : > { %vm643_vm10 = vcmp.ge.f32.partialorder %v627_v7, %v637_v22 }
 0x92e   : > { %v647_v23 = vsel %vm643_vm10, %v1314_v62, 32.0 }
 0x92f   : > { %v655_v26 = vsel %vm348_vm0, %v647_v23, inf }
 0x930   : > { %656 = vmin.xlane.f32.xlu1 %v655_v26  ;;  %v640_v27 = vpop.xlane.xlu0 %639 }
 0x931   : > { %vm644_vm11 = vcmp.ge.f32.partialorder %v628_v10, %v640_v27 }
 0x932   : > { %v648_v28 = vsel %vm644_vm11, %v1314_v62, 32.0 }
 0x933   : > { %v658_v11 = vsel %vm348_vm0, %v648_v28, inf }
 0x934   : > { %659 = vmin.xlane.f32.xlu0 %v658_v11 }
 0x9b9   : > { %v651_v35 = vpop.xlane.xlu1 %650  ;;  %v654_v29 = vpop.xlane.xlu0 %653 }
 0x9ba   : > { %vm661_vm14 = vcmp.eq.f32.partialorder %v1314_v62, %v651_v35  ;;  %v1012_v12 = vsel %vm1011_vm12, %v1007_v57, %v651_v35  ;;  %vm662_vm5 = vcmp.eq.f32.partialorder %v1314_v62, %v654_v29  ;;  %v1013_v36 = vsel %vm1011_vm12, %v1008_v61, %v654_v29 }
 0x9bb   : > { %v665_v59 = vsel %vm661_vm14, -inf, %v625_v63  ;;  %v666_v60 = vsel %vm662_vm5, -inf, %v626_v1  ;;  %vm1016_vm14 = vcmask 64512  }
 0x9bc   : > { %v669_v31 = vsel %vm348_vm0, %v665_v59, -inf  ;;  %v672_v24 = vsel %vm348_vm0, %v666_v60, -inf }
 0x9bd   : > { %670 = vmax.xlane.f32.xlu1 %v669_v31  ;;  %v1528_v25 = vpop.xlane.xlu1 %656  ;;  %673 = vmax.xlane.f32.xlu0 %v672_v24 }
 0x9be   : > { %vm663_vm6 = vcmp.eq.f32.partialorder %v1314_v62, %v1528_v25 }
 0x9bf   : > { %v667_v34 = vsel %vm663_vm6, -inf, %v627_v7 }
 0x9c0   : > { %v675_v37 = vsel %vm348_vm0, %v667_v34, -inf }
 0x9c1   : > { %676 = vmax.xlane.f32.xlu1 %v675_v37  ;;  %v1533_v39 = vpop.xlane.xlu0 %659 }
 0x9c2   : > { %vm664_vm7 = vcmp.eq.f32.partialorder %v1314_v62, %v1533_v39 }
 0x9c3   : > { %v668_v40 = vsel %vm664_vm7, -inf, %v628_v10 }
 0x9c4   : > { %v678_v42 = vsel %vm348_vm0, %v668_v40, -inf }
 0x9c5   : > { %679 = vmax.xlane.f32.xlu0 %v678_v42 }
 0xa4a   : > { %v671_v43 = vpop.xlane.xlu1 %670  ;;  %v674_v45 = vpop.xlane.xlu0 %673 }
 0xa4b   : > { %vm681_vm8 = vcmp.ge.f32.partialorder %v665_v59, %v671_v43  ;;  %vm682_vm9 = vcmp.ge.f32.partialorder %v666_v60, %v674_v45 }
 0xa4c   : > { %v685_v46 = vsel %vm681_vm8, %v1314_v62, 32.0  ;;  %v686_v47 = vsel %vm682_vm9, %v1314_v62, 32.0 }
 0xa4d   : > { %v689_v48 = vsel %vm348_vm0, %v685_v46, inf  ;;  %v692_v49 = vsel %vm348_vm0, %v686_v47, inf }
 0xa4e   : > { %690 = vmin.xlane.f32.xlu1 %v689_v48  ;;  %v677_v50 = vpop.xlane.xlu1 %676  ;;  %693 = vmin.xlane.f32.xlu0 %v692_v49 }
 0xa4f   : > { %vm683_vm10 = vcmp.ge.f32.partialorder %v667_v34, %v677_v50 }
 0xa50   : > { %v687_v51 = vsel %vm683_vm10, %v1314_v62, 32.0 }
 0xa51   : > { %v695_v52 = vsel %vm348_vm0, %v687_v51, inf }
 0xa52   : > { %696 = vmin.xlane.f32.xlu1 %v695_v52  ;;  %v680_v53 = vpop.xlane.xlu0 %679 }
 0xa53   : > { %vm684_vm11 = vcmp.ge.f32.partialorder %v668_v40, %v680_v53 }
 0xa54   : > { %v688_v54 = vsel %vm684_vm11, %v1314_v62, 32.0 }
 0xa55   : > { %v698_v55 = vsel %vm348_vm0, %v688_v54, inf }
 0xa56   : > { %699 = vmin.xlane.f32.xlu0 %v698_v55 }
 0xadb   : > { %v691_v56 = vpop.xlane.xlu1 %690  ;;  %v694_v57 = vpop.xlane.xlu0 %693 }
 0xadc   : > { %vm701_vm5 = vcmp.eq.f32.partialorder %v1314_v62, %v691_v56  ;;  %v1017_v61 = vsel %vm1016_vm14, %v1012_v12, %v691_v56  ;;  %vm702_vm6 = vcmp.eq.f32.partialorder %v1314_v62, %v694_v57  ;;  %v1018_v63 = vsel %vm1016_vm14, %v1013_v36, %v694_v57 }
 0xadd   : > { %v705_v1 = vsel %vm701_vm5, -inf, %v665_v59  ;;  %v706_v3 = vsel %vm702_vm6, -inf, %v666_v60  ;;  %vm1021_vm6 = vcmask 72704  }
 0xade   : > { %v709_v4 = vsel %vm348_vm0, %v705_v1, -inf  ;;  %v712_v7 = vsel %vm348_vm0, %v706_v3, -inf }
 0xadf   : > { %710 = vmax.xlane.f32.xlu1 %v709_v4  ;;  %v1552_v8 = vpop.xlane.xlu1 %696  ;;  %713 = vmax.xlane.f32.xlu0 %v712_v7 }
 0xae0   : > { %vm703_vm7 = vcmp.eq.f32.partialorder %v1314_v62, %v1552_v8 }
 0xae1   : > { %v707_v10 = vsel %vm703_vm7, -inf, %v667_v34 }
 0xae2   : > { %v715_v13 = vsel %vm348_vm0, %v707_v10, -inf }
 0xae3   : > { %716 = vmax.xlane.f32.xlu1 %v715_v13  ;;  %v1557_v14 = vpop.xlane.xlu0 %699 }
 0xae4   : > { %vm704_vm8 = vcmp.eq.f32.partialorder %v1314_v62, %v1557_v14 }
 0xae5   : > { %v708_v15 = vsel %vm704_vm8, -inf, %v668_v40 }
 0xae6   : > { %v718_v16 = vsel %vm348_vm0, %v708_v15, -inf }
 0xae7   : > { %719 = vmax.xlane.f32.xlu0 %v718_v16 }
 0xb6c   : > { %v711_v18 = vpop.xlane.xlu1 %710  ;;  %v714_v19 = vpop.xlane.xlu0 %713 }
 0xb6d   : > { %vm721_vm9 = vcmp.ge.f32.partialorder %v705_v1, %v711_v18  ;;  %vm722_vm10 = vcmp.ge.f32.partialorder %v706_v3, %v714_v19 }
 0xb6e   : > { %v725_v21 = vsel %vm721_vm9, %v1314_v62, 32.0  ;;  %v726_v22 = vsel %vm722_vm10, %v1314_v62, 32.0 }
 0xb6f   : > { %v729_v23 = vsel %vm348_vm0, %v725_v21, inf  ;;  %v732_v26 = vsel %vm348_vm0, %v726_v22, inf }
 0xb70   : > { %730 = vmin.xlane.f32.xlu1 %v729_v23  ;;  %v717_v27 = vpop.xlane.xlu1 %716  ;;  %733 = vmin.xlane.f32.xlu0 %v732_v26 }
 0xb71   : > { %vm723_vm11 = vcmp.ge.f32.partialorder %v707_v10, %v717_v27 }
 0xb72   : > { %v727_v28 = vsel %vm723_vm11, %v1314_v62, 32.0 }
 0xb73   : > { %v735_v11 = vsel %vm348_vm0, %v727_v28, inf }
 0xb74   : > { %736 = vmin.xlane.f32.xlu1 %v735_v11  ;;  %v720_v35 = vpop.xlane.xlu0 %719 }
 0xb75   : > { %vm724_vm5 = vcmp.ge.f32.partialorder %v708_v15, %v720_v35 }
 0xb76   : > { %v728_v29 = vsel %vm724_vm5, %v1314_v62, 32.0 }
 0xb77   : > { %v738_v12 = vsel %vm348_vm0, %v728_v29, inf }
 0xb78   : > { %739 = vmin.xlane.f32.xlu0 %v738_v12 }
 0xbfd   : > { %v731_v36 = vpop.xlane.xlu1 %730  ;;  %v734_v59 = vpop.xlane.xlu0 %733 }
 0xbfe   : > { %vm741_vm7 = vcmp.eq.f32.partialorder %v1314_v62, %v731_v36  ;;  %v1022_v60 = vsel %vm1021_vm6, %v1017_v61, %v731_v36  ;;  %vm742_vm8 = vcmp.eq.f32.partialorder %v1314_v62, %v734_v59  ;;  %v1023_v31 = vsel %vm1021_vm6, %v1018_v63, %v734_v59 }
 0xbff   : > { %v745_v24 = vsel %vm741_vm7, -inf, %v705_v1  ;;  %v746_v34 = vsel %vm742_vm8, -inf, %v706_v3 }
 0xc00   : > { %v749_v37 = vsel %vm348_vm0, %v745_v24, -inf  ;;  %v752_v40 = vsel %vm348_vm0, %v746_v34, -inf }
 0xc01   : > { %750 = vmax.xlane.f32.xlu1 %v749_v37  ;;  %v1576_v42 = vpop.xlane.xlu1 %736  ;;  %753 = vmax.xlane.f32.xlu0 %v752_v40 }
 0xc02   : > { %vm743_vm9 = vcmp.eq.f32.partialorder %v1314_v62, %v1576_v42 }
 0xc03   : > { %v747_v43 = vsel %vm743_vm9, -inf, %v707_v10  ;;  %vm1026_vm9 = vcmask 80896  }
 0xc04   : > { %v755_v45 = vsel %vm348_vm0, %v747_v43, -inf }
 0xc05   : > { %756 = vmax.xlane.f32.xlu1 %v755_v45  ;;  %v1581_v46 = vpop.xlane.xlu0 %739 }
 0xc06   : > { %vm744_vm10 = vcmp.eq.f32.partialorder %v1314_v62, %v1581_v46 }
 0xc07   : > { %v748_v47 = vsel %vm744_vm10, -inf, %v708_v15 }
 0xc08   : > { %v758_v48 = vsel %vm348_vm0, %v748_v47, -inf }
 0xc09   : > { %759 = vmax.xlane.f32.xlu0 %v758_v48 }
 0xc8e   : > { %v751_v49 = vpop.xlane.xlu1 %750  ;;  %v754_v50 = vpop.xlane.xlu0 %753 }
 0xc8f   : > { %vm761_vm11 = vcmp.ge.f32.partialorder %v745_v24, %v751_v49  ;;  %vm762_vm5 = vcmp.ge.f32.partialorder %v746_v34, %v754_v50 }
 0xc90   : > { %v765_v51 = vsel %vm761_vm11, %v1314_v62, 32.0  ;;  %v766_v52 = vsel %vm762_vm5, %v1314_v62, 32.0 }
 0xc91   : > { %v769_v53 = vsel %vm348_vm0, %v765_v51, inf  ;;  %v772_v54 = vsel %vm348_vm0, %v766_v52, inf }
 0xc92   : > { %770 = vmin.xlane.f32.xlu1 %v769_v53  ;;  %v757_v55 = vpop.xlane.xlu1 %756  ;;  %773 = vmin.xlane.f32.xlu0 %v772_v54 }
 0xc93   : > { %vm763_vm7 = vcmp.ge.f32.partialorder %v747_v43, %v757_v55 }
 0xc94   : > { %v767_v56 = vsel %vm763_vm7, %v1314_v62, 32.0 }
 0xc95   : > { %v775_v57 = vsel %vm348_vm0, %v767_v56, inf }
 0xc96   : > { %776 = vmin.xlane.f32.xlu1 %v775_v57  ;;  %v760_v61 = vpop.xlane.xlu0 %759 }
 0xc97   : > { %vm764_vm8 = vcmp.ge.f32.partialorder %v748_v47, %v760_v61 }
 0xc98   : > { %v768_v63 = vsel %vm764_vm8, %v1314_v62, 32.0 }
 0xc99   : > { %v778_v1 = vsel %vm348_vm0, %v768_v63, inf }
 0xc9a   : > { %779 = vmin.xlane.f32.xlu0 %v778_v1 }
 0xd1f   : > { %v771_v3 = vpop.xlane.xlu1 %770  ;;  %v774_v4 = vpop.xlane.xlu0 %773 }
 0xd20   : > { %vm781_vm10 = vcmp.eq.f32.partialorder %v1314_v62, %v771_v3  ;;  %v1027_v7 = vsel %vm1026_vm9, %v1022_v60, %v771_v3  ;;  %vm782_vm11 = vcmp.eq.f32.partialorder %v1314_v62, %v774_v4  ;;  %v1028_v10 = vsel %vm1026_vm9, %v1023_v31, %v774_v4 }
 0xd21   : > { %v785_v13 = vsel %vm781_vm10, -inf, %v745_v24  ;;  %v786_v15 = vsel %vm782_vm11, -inf, %v746_v34 }
 0xd22   : > { %v789_v16 = vsel %vm348_vm0, %v785_v13, -inf  ;;  %v792_v18 = vsel %vm348_vm0, %v786_v15, -inf }
 0xd23   : > { %790 = vmax.xlane.f32.xlu1 %v789_v16  ;;  %v1600_v19 = vpop.xlane.xlu1 %776  ;;  %793 = vmax.xlane.f32.xlu0 %v792_v18 }
 0xd24   : > { %vm783_vm5 = vcmp.eq.f32.partialorder %v1314_v62, %v1600_v19 }
 0xd25   : > { %v787_v21 = vsel %vm783_vm5, -inf, %v747_v43 }
 0xd26   : > { %v795_v22 = vsel %vm348_vm0, %v787_v21, -inf }
 0xd27   : > { %796 = vmax.xlane.f32.xlu1 %v795_v22  ;;  %v1605_v23 = vpop.xlane.xlu0 %779 }
 0xd28   : > { %vm784_vm7 = vcmp.eq.f32.partialorder %v1314_v62, %v1605_v23 }
 0xd29   : > { %v788_v26 = vsel %vm784_vm7, -inf, %v748_v47  ;;  %vm1798_vm7 = vcmask 89088  }
 0xd2a   : > { %v798_v27 = vsel %vm348_vm0, %v788_v26, -inf }
 0xd2b   : > { %799 = vmax.xlane.f32.xlu0 %v798_v27 }
 0xdb0   : > { %v791_v28 = vpop.xlane.xlu1 %790  ;;  %v794_v11 = vpop.xlane.xlu0 %793 }
 0xdb1   : > { %vm801_vm8 = vcmp.ge.f32.partialorder %v785_v13, %v791_v28  ;;  %vm802_vm10 = vcmp.ge.f32.partialorder %v786_v15, %v794_v11 }
 0xdb2   : > { %v805_v35 = vsel %vm801_vm8, %v1314_v62, 32.0  ;;  %v806_v29 = vsel %vm802_vm10, %v1314_v62, 32.0 }
 0xdb3   : > { %v809_v12 = vsel %vm348_vm0, %v805_v35, inf  ;;  %v812_v36 = vsel %vm348_vm0, %v806_v29, inf }
 0xdb4   : > { %810 = vmin.xlane.f32.xlu1 %v809_v12  ;;  %v797_v59 = vpop.xlane.xlu1 %796  ;;  %813 = vmin.xlane.f32.xlu0 %v812_v36 }
 0xdb5   : > { %vm803_vm11 = vcmp.ge.f32.partialorder %v787_v21, %v797_v59 }
 0xdb6   : > { %v807_v60 = vsel %vm803_vm11, %v1314_v62, 32.0 }
 0xdb7   : > { %v815_v31 = vsel %vm348_vm0, %v807_v60, inf }
 0xdb8   : > { %816 = vmin.xlane.f32.xlu1 %v815_v31  ;;  %v800_v24 = vpop.xlane.xlu0 %799 }
 0xdb9   : > { %vm804_vm5 = vcmp.ge.f32.partialorder %v788_v26, %v800_v24 }
 0xdba   : > { %v808_v34 = vsel %vm804_vm5, %v1314_v62, 32.0 }
 0xdbb   : > { %v818_v37 = vsel %vm348_vm0, %v808_v34, inf }
 0xdbc   : > { %819 = vmin.xlane.f32.xlu0 %v818_v37 }
 0xe41   : > { %v811_v40 = vpop.xlane.xlu1 %810  ;;  %v814_v43 = vpop.xlane.xlu0 %813 }
 0xe42   : > { %vm821_vm8 = vcmp.eq.f32.partialorder %v1314_v62, %v811_v40  ;;  %v1032_v45 = vsel %vm1798_vm7, %v1027_v7, %v811_v40  ;;  %vm822_vm10 = vcmp.eq.f32.partialorder %v1314_v62, %v814_v43  ;;  %v1033_v47 = vsel %vm1798_vm7, %v1028_v10, %v814_v43 }
 0xe43   : > { %v825_v48 = vsel %vm821_vm8, -inf, %v785_v13  ;;  %v826_v49 = vsel %vm822_vm10, -inf, %v786_v15 }
 0xe44   : > { %v829_v50 = vsel %vm348_vm0, %v825_v48, -inf  ;;  %v832_v51 = vsel %vm348_vm0, %v826_v49, -inf }
 0xe45   : > { %830 = vmax.xlane.f32.xlu1 %v829_v50  ;;  %v1624_v52 = vpop.xlane.xlu1 %816  ;;  %833 = vmax.xlane.f32.xlu0 %v832_v51 }
 0xe46   : > { %vm823_vm11 = vcmp.eq.f32.partialorder %v1314_v62, %v1624_v52 }
 0xe47   : > { %v827_v53 = vsel %vm823_vm11, -inf, %v787_v21 }
 0xe48   : > { %v835_v54 = vsel %vm348_vm0, %v827_v53, -inf }
 0xe49   : > { %836 = vmax.xlane.f32.xlu1 %v835_v54  ;;  %v1629_v55 = vpop.xlane.xlu0 %819 }
 0xe4a   : > { %vm824_vm5 = vcmp.eq.f32.partialorder %v1314_v62, %v1629_v55 }
 0xe4b   : > { %v828_v56 = vsel %vm824_vm5, -inf, %v788_v26 }
 0xe4c   : > { %v838_v57 = vsel %vm348_vm0, %v828_v56, -inf }
 0xe4d   : > { %839 = vmax.xlane.f32.xlu0 %v838_v57 }
 0xed2   : > { %v831_v61 = vpop.xlane.xlu1 %830  ;;  %v834_v63 = vpop.xlane.xlu0 %833 }
 0xed3   : > { %vm841_vm8 = vcmp.ge.f32.partialorder %v825_v48, %v831_v61  ;;  %vm842_vm10 = vcmp.ge.f32.partialorder %v826_v49, %v834_v63 }
 0xed4   : > { %v845_v1 = vsel %vm841_vm8, %v1314_v62, 32.0  ;;  %v846_v3 = vsel %vm842_vm10, %v1314_v62, 32.0  ;;  %vm1799_vm8 = vcmask 97280  }
 0xed5   : > { %v849_v4 = vsel %vm348_vm0, %v845_v1, inf  ;;  %v852_v7 = vsel %vm348_vm0, %v846_v3, inf }
 0xed6   : > { %850 = vmin.xlane.f32.xlu1 %v849_v4  ;;  %v837_v10 = vpop.xlane.xlu1 %836  ;;  %853 = vmin.xlane.f32.xlu0 %v852_v7 }
 0xed7   : > { %vm843_vm11 = vcmp.ge.f32.partialorder %v827_v53, %v837_v10 }
 0xed8   : > { %v847_v13 = vsel %vm843_vm11, %v1314_v62, 32.0 }
 0xed9   : > { %v855_v15 = vsel %vm348_vm0, %v847_v13, inf }
 0xeda   : > { %856 = vmin.xlane.f32.xlu1 %v855_v15  ;;  %v840_v16 = vpop.xlane.xlu0 %839 }
 0xedb   : > { %vm844_vm5 = vcmp.ge.f32.partialorder %v828_v56, %v840_v16 }
 0xedc   : > { %v848_v18 = vsel %vm844_vm5, %v1314_v62, 32.0 }
 0xedd   : > { %v858_v21 = vsel %vm348_vm0, %v848_v18, inf }
 0xede   : > { %859 = vmin.xlane.f32.xlu0 %v858_v21 }
 0xf63   : > { %v851_v22 = vpop.xlane.xlu1 %850  ;;  %v854_v26 = vpop.xlane.xlu0 %853 }
 0xf64   : > { %vm861_vm10 = vcmp.eq.f32.partialorder %v1314_v62, %v851_v22  ;;  %v1037_v27 = vsel %vm1799_vm8, %v1032_v45, %v851_v22  ;;  %vm862_vm7 = vcmp.eq.f32.partialorder %v1314_v62, %v854_v26  ;;  %v1038_v28 = vsel %vm1799_vm8, %v1033_v47, %v854_v26 }
 0xf65   : > { %v865_v11 = vsel %vm861_vm10, -inf, %v825_v48  ;;  %v866_v35 = vsel %vm862_vm7, -inf, %v826_v49 }
 0xf66   : > { %v869_v29 = vsel %vm348_vm0, %v865_v11, -inf  ;;  %v872_v12 = vsel %vm348_vm0, %v866_v35, -inf }
 0xf67   : > { %870 = vmax.xlane.f32.xlu1 %v869_v29  ;;  %v1648_v36 = vpop.xlane.xlu1 %856  ;;  %873 = vmax.xlane.f32.xlu0 %v872_v12 }
 0xf68   : > { %vm863_vm11 = vcmp.eq.f32.partialorder %v1314_v62, %v1648_v36 }
 0xf69   : > { %v867_v59 = vsel %vm863_vm11, -inf, %v827_v53 }
 0xf6a   : > { %v875_v60 = vsel %vm348_vm0, %v867_v59, -inf }
 0xf6b   : > { %876 = vmax.xlane.f32.xlu1 %v875_v60  ;;  %v1653_v31 = vpop.xlane.xlu0 %859 }
 0xf6c   : > { %vm864_vm7 = vcmp.eq.f32.partialorder %v1314_v62, %v1653_v31 }
 0xf6d   : > { %v868_v24 = vsel %vm864_vm7, -inf, %v828_v56 }
 0xf6e   : > { %v878_v34 = vsel %vm348_vm0, %v868_v24, -inf }
 0xf6f   : > { %879 = vmax.xlane.f32.xlu0 %v878_v34 }
 0xff4   : > { %v871_v37 = vpop.xlane.xlu1 %870  ;;  %v874_v40 = vpop.xlane.xlu0 %873 }
 0xff5   : > { %vm881_vm5 = vcmp.ge.f32.partialorder %v865_v11, %v871_v37  ;;  %vm882_vm10 = vcmp.ge.f32.partialorder %v866_v35, %v874_v40 }
 0xff6   : > { %v885_v43 = vsel %vm881_vm5, %v1314_v62, 32.0  ;;  %v886_v45 = vsel %vm882_vm10, %v1314_v62, 32.0  ;;  %vm1800_vm5 = vcmask 105472  }
 0xff7   : > { %v889_v47 = vsel %vm348_vm0, %v885_v43, inf  ;;  %v892_v48 = vsel %vm348_vm0, %v886_v45, inf }
 0xff8   : > { %890 = vmin.xlane.f32.xlu1 %v889_v47  ;;  %v877_v49 = vpop.xlane.xlu1 %876  ;;  %893 = vmin.xlane.f32.xlu0 %v892_v48 }
 0xff9   : > { %vm883_vm11 = vcmp.ge.f32.partialorder %v867_v59, %v877_v49 }
 0xffa   : > { %v887_v50 = vsel %vm883_vm11, %v1314_v62, 32.0 }
 0xffb   : > { %v895_v51 = vsel %vm348_vm0, %v887_v50, inf }
 0xffc   : > { %896 = vmin.xlane.f32.xlu1 %v895_v51  ;;  %v880_v53 = vpop.xlane.xlu0 %879 }
 0xffd   : > { %vm884_vm7 = vcmp.ge.f32.partialorder %v868_v24, %v880_v53 }
 0xffe   : > { %v888_v54 = vsel %vm884_vm7, %v1314_v62, 32.0 }
 0xfff   : > { %v898_v56 = vsel %vm348_vm0, %v888_v54, inf }
0x1000   : > { %899 = vmin.xlane.f32.xlu0 %v898_v56 }
0x1085   : > { %v891_v57 = vpop.xlane.xlu1 %890  ;;  %v894_v61 = vpop.xlane.xlu0 %893 }
0x1086   : > { %vm901_vm10 = vcmp.eq.f32.partialorder %v1314_v62, %v891_v57  ;;  %v1042_v63 = vsel %vm1800_vm5, %v1037_v27, %v891_v57  ;;  %vm902_vm8 = vcmp.eq.f32.partialorder %v1314_v62, %v894_v61  ;;  %v1043_v1 = vsel %vm1800_vm5, %v1038_v28, %v894_v61 }
0x1087   : > { %v905_v3 = vsel %vm901_vm10, -inf, %v865_v11  ;;  %v906_v4 = vsel %vm902_vm8, -inf, %v866_v35 }
0x1088   : > { %v909_v7 = vsel %vm348_vm0, %v905_v3, -inf  ;;  %v912_v10 = vsel %vm348_vm0, %v906_v4, -inf }
0x1089   : > { %910 = vmax.xlane.f32.xlu1 %v909_v7  ;;  %v1672_v13 = vpop.xlane.xlu1 %896  ;;  %913 = vmax.xlane.f32.xlu0 %v912_v10 }
0x108a   : > { %vm903_vm11 = vcmp.eq.f32.partialorder %v1314_v62, %v1672_v13 }
0x108b   : > { %v907_v15 = vsel %vm903_vm11, -inf, %v867_v59 }
0x108c   : > { %v915_v16 = vsel %vm348_vm0, %v907_v15, -inf }
0x108d   : > { %916 = vmax.xlane.f32.xlu1 %v915_v16  ;;  %v1677_v18 = vpop.xlane.xlu0 %899 }
0x108e   : > { %vm904_vm8 = vcmp.eq.f32.partialorder %v1314_v62, %v1677_v18 }
0x108f   : > { %v908_v21 = vsel %vm904_vm8, -inf, %v868_v24 }
0x1090   : > { %v918_v22 = vsel %vm348_vm0, %v908_v21, -inf }
0x1091   : > { %919 = vmax.xlane.f32.xlu0 %v918_v22 }
0x1116   : > { %v911_v26 = vpop.xlane.xlu1 %910  ;;  %v914_v27 = vpop.xlane.xlu0 %913 }
0x1117   : > { %vm921_vm7 = vcmp.ge.f32.partialorder %v905_v3, %v911_v26  ;;  %vm922_vm10 = vcmp.ge.f32.partialorder %v906_v4, %v914_v27 }
0x1118   : > { %v925_v28 = vsel %vm921_vm7, %v1314_v62, 32.0  ;;  %v926_v11 = vsel %vm922_vm10, %v1314_v62, 32.0  ;;  %vm1046_vm7 = vcmask 113664  }
0x1119   : > { %v929_v35 = vsel %vm348_vm0, %v925_v28, inf  ;;  %v932_v29 = vsel %vm348_vm0, %v926_v11, inf  ;;  %v984_v11 = vsel %vm981_vm15, %v1334_v17, %v1362_v41 }
0x111a   : > { %930 = vmin.xlane.f32.xlu1 %v929_v35  ;;  %v917_v12 = vpop.xlane.xlu1 %916  ;;  %933 = vmin.xlane.f32.xlu0 %v932_v29  ;;  %v989_v35 = vsel %vm986_vm1, %v984_v11, %v1390_v2 }
0x111b   : > { %vm923_vm11 = vcmp.ge.f32.partialorder %v907_v15, %v917_v12  ;;  %v994_v29 = vsel %vm991_vm2, %v989_v35, %v1418_v30 }
0x111c   : > { %v927_v59 = vsel %vm923_vm11, %v1314_v62, 32.0  ;;  %v999_v12 = vsel %vm996_vm3, %v994_v29, %v1440_v58 }
0x111d   : > { %v935_v60 = vsel %vm348_vm0, %v927_v59, inf  ;;  %v1004_v59 = vsel %vm1001_vm4, %v999_v12, %v1480_v32 }
0x111e   : > { %936 = vmin.xlane.f32.xlu1 %v935_v60  ;;  %v920_v24 = vpop.xlane.xlu0 %919  ;;  %v1009_v17 = vsel %vm1006_vm13, %v1004_v59, %v1504_v6 }
0x111f   : > { %vm924_vm8 = vcmp.ge.f32.partialorder %v908_v21, %v920_v24  ;;  %v1014_v2 = vsel %vm1011_vm12, %v1009_v17, %v1528_v25 }
0x1120   : > { %v928_v34 = vsel %vm924_vm8, %v1314_v62, 32.0 }
0x1121   : > { %v938_v37 = vsel %vm348_vm0, %v928_v34, inf }
0x1122   : > { %939 = vmin.xlane.f32.xlu0 %v938_v37 }
0x11a7   : > { %v931_v40 = vpop.xlane.xlu1 %930  ;;  %v934_v43 = vpop.xlane.xlu0 %933 }
0x11a8   : > { %vm941_vm10 = vcmp.eq.f32.partialorder %v1314_v62, %v931_v40  ;;  %v1047_v45 = vsel %vm1046_vm7, %v1042_v63, %v931_v40  ;;  %vm942_vm5 = vcmp.eq.f32.partialorder %v1314_v62, %v934_v43  ;;  %v1048_v47 = vsel %vm1046_vm7, %v1043_v1, %v934_v43 }
0x11a9   : > { %v945_v48 = vsel %vm941_vm10, -inf, %v905_v3  ;;  %v946_v49 = vsel %vm942_vm5, -inf, %v906_v4 }
0x11aa   : > { %v949_v50 = vsel %vm348_vm0, %v945_v48, -inf  ;;  %v952_v51 = vsel %vm348_vm0, %v946_v49, -inf }
0x11ab   : > { %950 = vmax.xlane.f32.xlu1 %v949_v50  ;;  %v1696_v53 = vpop.xlane.xlu1 %936  ;;  %953 = vmax.xlane.f32.xlu0 %v952_v51 }
0x11ac   : > { %vm943_vm11 = vcmp.eq.f32.partialorder %v1314_v62, %v1696_v53 }
0x11ad   : > { %v947_v54 = vsel %vm943_vm11, -inf, %v907_v15 }
0x11ae   : > { %v955_v56 = vsel %vm348_vm0, %v947_v54, -inf }
0x11af   : > { %956 = vmax.xlane.f32.xlu1 %v955_v56  ;;  %v1701_v57 = vpop.xlane.xlu0 %939 }
0x11b0   : > { %vm944_vm5 = vcmp.eq.f32.partialorder %v1314_v62, %v1701_v57 }
0x11b1   : > { %v948_v61 = vsel %vm944_vm5, -inf, %v908_v21 }
0x11b2   : > { %v958_v63 = vsel %vm348_vm0, %v948_v61, -inf }
0x11b3   : > { %959 = vmax.xlane.f32.xlu0 %v958_v63 }
0x1238   : > { %v951_v1 = vpop.xlane.xlu1 %950  ;;  %v954_v3 = vpop.xlane.xlu0 %953 }
0x1239   : > { %vm961_vm8 = vcmp.ge.f32.partialorder %v945_v48, %v951_v1  ;;  %vm962_vm10 = vcmp.ge.f32.partialorder %v946_v49, %v954_v3 }
0x123a   : > { %v965_v4 = vsel %vm961_vm8, %v1314_v62, 32.0  ;;  %v966_v7 = vsel %vm962_vm10, %v1314_v62, 32.0 }
0x123b   : > { %v969_v10 = vsel %vm348_vm0, %v965_v4, inf  ;;  %v972_v15 = vsel %vm348_vm0, %v966_v7, inf }
0x123c   : > { %970 = vmin.xlane.f32.xlu1 %v969_v10  ;;  %v957_v16 = vpop.xlane.xlu1 %956  ;;  %973 = vmin.xlane.f32.xlu0 %v972_v15 }
0x123d   : > { %vm963_vm11 = vcmp.ge.f32.partialorder %v947_v54, %v957_v16 }
0x123e   : > { %v967_v21 = vsel %vm963_vm11, %v1314_v62, 32.0 }
0x123f   : > { %v975_v22 = vsel %vm348_vm0, %v967_v21, inf }
0x1240   : > { %976 = vmin.xlane.f32.xlu1 %v975_v22  ;;  %v960_v26 = vpop.xlane.xlu0 %959 }
0x1241   : > { %vm964_vm5 = vcmp.ge.f32.partialorder %v948_v61, %v960_v26 }
0x1242   : > { %v968_v27 = vsel %vm964_vm5, %v1314_v62, 32.0  ;;  %v985_v62 = vsel %vm981_vm15, %v1339_v20, %v1367_v44  ;;  %v1019_v20 = vsel %vm1016_vm14, %v1014_v2, %v1552_v8  ;;  %vm1801_vm15 = vcmask 89088  }
0x1243   : > { %v978_v28 = vsel %vm348_vm0, %v968_v27, inf  ;;  %v990_v60 = vsel %vm986_vm1, %v985_v62, %v1395_v5  ;;  %vm1051_vm0 = vcmask 121856   ;;  %v1024_v5 = vsel %vm1021_vm6, %v1019_v20, %v1576_v42 }
0x1244   : > { %979 = vmin.xlane.f32.xlu0 %v978_v28  ;;  %v995_v41 = vsel %vm991_vm2, %v990_v60, %v1423_v33  ;;  %v1029_v58 = vsel %vm1026_vm9, %v1024_v5, %v1600_v19  ;;  %vm1802_vm1 = vcmask 97280   ;;  %vm1803_vm2 = vcmask 105472  }
0x1245   : > { %v1000_v30 = vsel %vm996_vm3, %v995_v41, %v1445_v0  ;;  %v1034_v25 = vsel %vm1801_vm15, %v1029_v58, %v1624_v52  ;;  %vm1060_vm3 = vcmask 130048  }
0x1246   : > { %v1005_v44 = vsel %vm1001_vm4, %v1000_v30, %v1485_v38  ;;  %vm1804_vm4 = vmmov %vm1801_vm15 }
0x1247   : > { %v1010_v33 = vsel %vm1006_vm13, %v1005_v44, %v1509_v9  ;;  %v1039_v9 = vsel %vm1802_vm1, %v1034_v25, %v1648_v36  ;;  %vm1805_vm13 = vmmov %vm1802_vm1 }
0x1248   : > { %v1015_v0 = vsel %vm1011_vm12, %v1010_v33, %v1533_v39  ;;  %v1044_v52 = vsel %vm1803_vm2, %v1039_v9, %v1672_v13  ;;  %vm1806_vm12 = vmmov %vm1803_vm2 }
0x1249   : > { %v1020_v42 = vsel %vm1016_vm14, %v1015_v0, %v1557_v14  ;;  %v1049_v36 = vsel %vm1046_vm7, %v1044_v52, %v1696_v53 }
0x124a   : > { %v1025_v39 = vsel %vm1021_vm6, %v1020_v42, %v1581_v46 }
0x124b   : > { %v1030_v14 = vsel %vm1026_vm9, %v1025_v39, %v1605_v23 }
0x124c   : > { %v1035_v43 = vsel %vm1804_vm4, %v1030_v14, %v1629_v55 }
0x124d   : > { %v1040_v46 = vsel %vm1805_vm13, %v1035_v43, %v1653_v31 }
0x124e   : > { %v1045_v23 = vsel %vm1806_vm12, %v1040_v46, %v1677_v18 }
0x12c9   : > { %v971_v32 = vpop.xlane.xlu1 %970  ;;  %v974_v6 = vpop.xlane.xlu0 %973 }
0x12ca   : > { %v1052_v8 = vsel %vm1051_vm0, %v1047_v45, %v971_v32  ;;  %v1053_v38 = vsel %vm1051_vm0, %v1048_v47, %v974_v6  ;;  %v1050_v47 = vsel %vm1046_vm7, %v1045_v23, %v1701_v57 }
0x12cb   : > { %v1188_v24 = vtrunc.f32 %v1052_v8  ;;  %v1190_v19 = vtrunc.f32 %v1053_v38 }
0x12cd   : > { %v1189_v34 = vcvt.f32.s32 %v1188_v24  ;;  %v1191_v37 = vcvt.f32.s32 %v1190_v19  ;;  %v977_v40 = vpop.xlane.xlu1 %976 }
0x12ce   : > { %v1054_v45 = vsel %vm1051_vm0, %v1049_v36, %v977_v40 }
0x12cf   : > { %1061 = vst.msk [vmem:[%s239_s29] sm:$0xff] %vm1060_vm3, %v1189_v34  ;;  %1062 = vst.msk [vmem:[%s239_s29 + $0x8] sm:$0xff] %vm1060_vm3, %v1191_v37  ;;  %v1192_v13 = vtrunc.f32 %v1054_v45 }
0x12d1   : > { %v1193_v48 = vcvt.f32.s32 %v1192_v13  ;;  %v980_v49 = vpop.xlane.xlu0 %979 }
0x12d2   : > { %v1055_v55 = vsel %vm1051_vm0, %v1050_v47, %v980_v49 }
0x12d3   : > { %1063 = vst.msk [vmem:[%s239_s29 + $0x10] sm:$0xff] %vm1060_vm3, %v1193_v48  ;;  %v1194_v50 = vtrunc.f32 %v1055_v55 }
0x12d5   : > { %v1195_v51 = vcvt.f32.s32 %v1194_v50 }
0x12d7   : > { %1064 = vst.msk [vmem:[%s239_s29 + $0x18] sm:$0xff] %vm1060_vm3, %v1195_v51 }
0x12d8 PF: > { %s13_s14 = sadd.s32 1, %s1251_s14   ;;  %s1807_s12 = smov %s1247_s13 }
0x12d9   : > { %p10_p5 = scmp.ge.s32.totalorder %s13_s14, 4   ;;  %s1808_s13 = smov %s1810_s15 }
0x12db   :  { %12 = sbr.rel (!%p10_p5) target bundleno = 2 (0x2), region = 68 }

</bundles_post_ra>
